<compile_context>
chip_gen: v7x
topology: tpu7x:2x2x1
jax: 0.10.0
libtpu: 0.0.40
codegen_flags: <defaults>
</compile_context>

<pallas_src>
import numpy as np
import jax
import jax.numpy as jnp
from jax.experimental import pallas as pl
from jax.experimental.pallas import tpu as pltpu

LANE = 128


def _round_up(n, m):
    return ((n + m - 1) // m) * m


def _fvae_kernel(x_ref, eps_ref,
                 we1_ref, be1_ref, we2_ref, be2_ref, we3_ref, be3_ref,
                 wh_ref, bh_ref,
                 wd1_ref, bd1_ref, wd2_ref, bd2_ref, wd3_ref, bd3_ref,
                 recon_ref, mu_ref, std_ref):
    f32 = jnp.float32
    bf16 = jnp.bfloat16
    lat_p = mu_ref.shape[-1]

    # ---- encoder ----
    h = jnp.dot(x_ref[...], we1_ref[...], preferred_element_type=f32) + be1_ref[...]
    h = jnp.maximum(h, 0.0)
    h = jnp.dot(h.astype(bf16), we2_ref[...], preferred_element_type=f32) + be2_ref[...]
    h = jnp.maximum(h, 0.0)
    h = jnp.dot(h.astype(bf16), we3_ref[...], preferred_element_type=f32) + be3_ref[...]

    # ---- fused mu / std head (each half lane-padded to lat_p; one 2*lat_p-wide matmul) ----
    head = jnp.dot(h.astype(bf16), wh_ref[...], preferred_element_type=f32) + bh_ref[...]
    mu = head[:, :lat_p]
    sp_in = head[:, lat_p:]
    # softplus (numerically stable) followed by Hardtanh clamp to [1e-4, 5.0]
    sp = jnp.maximum(sp_in, 0.0) + jnp.log(1.0 + jnp.exp(-jnp.abs(sp_in)))
    std = jnp.minimum(jnp.maximum(sp, 1e-4), 5.0)

    # ---- reparameterize: z = eps * std + mu ----
    z = eps_ref[...] * std + mu

    # ---- decoder ----
    d = jnp.dot(z.astype(bf16), wd1_ref[...], preferred_element_type=f32) + bd1_ref[...]
    d = jnp.maximum(d, 0.0)
    d = jnp.dot(d.astype(bf16), wd2_ref[...], preferred_element_type=f32) + bd2_ref[...]
    d = jnp.maximum(d, 0.0)
    logits = jnp.dot(d.astype(bf16), wd3_ref[...], preferred_element_type=f32) + bd3_ref[...]
    # sigmoid = 1 / (1 + exp(-x)); exp and approx reciprocal both issue on the EUP slot.
    recon_ref[...] = pl.reciprocal(1.0 + jnp.exp(-logits), approx=True)
    mu_ref[...] = mu
    std_ref[...] = std


def init_params(key, d_in, encoder_size, decoder_size, latent_size):
    """torch.nn.Linear-style init (U[-1/sqrt(fan_in), 1/sqrt(fan_in)]).
    Weights stored as (in_features, out_features); biases as (1, out_features)."""
    def linear(k, fan_in, fan_out):
        kw, kb = jax.random.split(k)
        bound = 1.0 / np.sqrt(fan_in)
        w = jax.random.uniform(kw, (fan_in, fan_out), jnp.float32, -bound, bound)
        b = jax.random.uniform(kb, (1, fan_out), jnp.float32, -bound, bound)
        return w, b

    half_e = encoder_size // 2
    half_d = decoder_size // 2
    ks = jax.random.split(key, 8)
    p = {}
    p["we1"], p["be1"] = linear(ks[0], d_in, encoder_size)
    p["we2"], p["be2"] = linear(ks[1], encoder_size, half_e)
    p["we3"], p["be3"] = linear(ks[2], half_e, half_e)
    p["wmu"], p["bmu"] = linear(ks[3], half_e, latent_size)
    p["wstd"], p["bstd"] = linear(ks[4], half_e, latent_size)
    p["wd1"], p["bd1"] = linear(ks[5], latent_size, half_d)
    p["wd2"], p["bd2"] = linear(ks[6], half_d, decoder_size)
    p["wd3"], p["bd3"] = linear(ks[7], decoder_size, d_in)
    return p


def pack_params(p, d_in, encoder_size, decoder_size, latent_size):
    """Zero-pad every feature dim up to a multiple of 128 lanes, fuse the mu/std heads into a
    single (enc//2_p, 2*lat_p) weight, and store matmul weights in bf16 (biases stay f32)."""
    half_e = encoder_size // 2
    half_d = decoder_size // 2
    d_in_p = _round_up(d_in, LANE)
    enc_p = _round_up(encoder_size, LANE)
    he_p = _round_up(half_e, LANE)
    lat_p = _round_up(latent_size, LANE)
    hd_p = _round_up(half_d, LANE)
    dec_p = _round_up(decoder_size, LANE)

    def pad_w(w, rows, cols):
        r, c = w.shape
        return jnp.zeros((rows, cols), jnp.float32).at[:r, :c].set(w).astype(jnp.bfloat16)

    def pad_b(b, cols):
        return jnp.zeros((1, cols), jnp.float32).at[:, : b.shape[1]].set(b)

    packed = {
        "we1": pad_w(p["we1"], d_in_p, enc_p), "be1": pad_b(p["be1"], enc_p),
        "we2": pad_w(p["we2"], enc_p, he_p),   "be2": pad_b(p["be2"], he_p),
        "we3": pad_w(p["we3"], he_p, he_p),    "be3": pad_b(p["be3"], he_p),
        "wd1": pad_w(p["wd1"], lat_p, hd_p),   "bd1": pad_b(p["bd1"], hd_p),
        "wd2": pad_w(p["wd2"], hd_p, dec_p),   "bd2": pad_b(p["bd2"], dec_p),
        "wd3": pad_w(p["wd3"], dec_p, d_in_p), "bd3": pad_b(p["bd3"], d_in_p),
    }
    # fused [mu | std] projection, each half padded to lat_p lanes
    wh = jnp.zeros((he_p, 2 * lat_p), jnp.float32)
    wh = wh.at[:half_e, :latent_size].set(p["wmu"])
    wh = wh.at[:half_e, lat_p:lat_p + latent_size].set(p["wstd"])
    bh = jnp.zeros((1, 2 * lat_p), jnp.float32)
    bh = bh.at[:, :latent_size].set(p["bmu"])
    bh = bh.at[:, lat_p:lat_p + latent_size].set(p["bstd"])
    packed["wh"] = wh.astype(jnp.bfloat16)
    packed["bh"] = bh
    return packed


_PARAM_ORDER = ("we1", "be1", "we2", "be2", "we3", "be3", "wh", "bh",
                "wd1", "bd1", "wd2", "bd2", "wd3", "bd3")


def fvae_forward(x, packed, eps, *, latent_size, block_batch=256):
    """x: (B, C, H, W) float32; eps: (B, latent_size) float32. Returns (x_hat, mu, std)."""
    B = x.shape[0]
    d_in = int(np.prod(x.shape[1:]))
    x_flat = x.reshape(B, d_in)                     # x.view(-1, input_shape)

    d_in_p = packed["we1"].shape[0]
    enc_p = packed["we1"].shape[1]
    he_p = packed["we2"].shape[1]
    head_p = packed["wh"].shape[1]
    lat_p = packed["wd1"].shape[0]
    hd_p = packed["wd1"].shape[1]
    dec_p = packed["wd2"].shape[1]

    # Batch tiling: pad batch to >= 16 rows (bf16 sublane tile) and a multiple of the tile.
    TB = min(block_batch, _round_up(B, 16))
    B_pad = _round_up(B, TB)
    grid = (B_pad // TB,)

    # TODO(synk): eps could be generated on-chip (pltpu.prng_seed + pltpu.stateful_normal) to
    # drop one HBM stream; it is kept as an input so the forward stays deterministic/verifiable.
    x_p = jnp.zeros((B_pad, d_in_p), jnp.bfloat16).at[:B, :d_in].set(
        x_flat.astype(jnp.bfloat16))
    eps_p = jnp.zeros((B_pad, lat_p), jnp.float32).at[:B, :latent_size].set(eps)

    weight_args = [packed[k] for k in _PARAM_ORDER]
    weight_specs = [pl.BlockSpec(packed[k].shape, lambda i: (0, 0)) for k in _PARAM_ORDER]

    in_specs = [pl.BlockSpec((TB, d_in_p), lambda i: (i, 0)),
                pl.BlockSpec((TB, lat_p), lambda i: (i, 0))] + weight_specs
    out_specs = (pl.BlockSpec((TB, d_in_p), lambda i: (i, 0)),
                 pl.BlockSpec((TB, lat_p), lambda i: (i, 0)),
                 pl.BlockSpec((TB, lat_p), lambda i: (i, 0)))
    out_shape = (jax.ShapeDtypeStruct((B_pad, d_in_p), jnp.float32),   # reconstruction
                 jax.ShapeDtypeStruct((B_pad, lat_p), jnp.float32),    # mu
                 jax.ShapeDtypeStruct((B_pad, lat_p), jnp.float32))    # std

    # VMEM budget: double-buffered batch tiles + resident (double-buffered) weights + slack.
    w_bytes = sum(int(np.prod(packed[k].shape)) * packed[k].dtype.itemsize
                  for k in _PARAM_ORDER)
    io_tile_bytes = TB * d_in_p * 2 + TB * lat_p * 4 + TB * d_in_p * 4 + 2 * TB * lat_p * 4
    vmem_limit = int(min(60 * 1024 * 1024, 2 * (w_bytes + io_tile_bytes) + (8 << 20)))

    mm_flops = (d_in_p * enc_p + enc_p * he_p + he_p * he_p + he_p * head_p
                + lat_p * hd_p + hd_p * dec_p + dec_p * d_in_p)
    cost = pl.CostEstimate(
        flops=int(2 * B_pad * mm_flops),
        transcendentals=int(B_pad * (d_in_p + head_p)),
        bytes_accessed=int(x_p.size * 2 + eps_p.size * 4 + w_bytes
                           + B_pad * d_in_p * 4 + 2 * B_pad * lat_p * 4),
    )

    fn = pl.pallas_call(
        _fvae_kernel,
        grid=grid,
        in_specs=in_specs,
        out_specs=out_specs,
        out_shape=out_shape,
        compiler_params=pltpu.CompilerParams(
            dimension_semantics=("parallel",),
            vmem_limit_bytes=vmem_limit),
        cost_estimate=cost,
    )
    recon_p, mu_p, std_p = fn(x_p, eps_p, *weight_args)
    return (recon_p[:B, :d_in], mu_p[:B, :latent_size], std_p[:B, :latent_size])


if __name__ == "__main__":
    # Small shapes consistent with the module: input_shape=(4,16,16) -> 1024 features.
    B, C, H, W = 2, 4, 16, 16
    encoder_size, decoder_size, latent_size = 64, 64, 32
    d_in = C * H * W

    key = jax.random.PRNGKey(0)
    k_x, k_eps, k_params = jax.random.split(key, 3)
    x = jax.random.uniform(k_x, (B, C, H, W), jnp.float32)
    eps = jax.random.normal(k_eps, (B, latent_size), jnp.float32)   # torch.randn_like(std)

    params = init_params(k_params, d_in, encoder_size, decoder_size, latent_size)
    packed = pack_params(params, d_in, encoder_size, decoder_size, latent_size)

    recon, mu, std = fvae_forward(x, packed, eps, latent_size=latent_size)
    jax.block_until_ready((recon, mu, std))

    # ---- pure-JAX reference mirroring the kernel numerics (bf16 operands, f32 accumulate) ----
    bf16 = jnp.bfloat16

    def bdot(a, w):
        return jnp.dot(a.astype(bf16), w.astype(bf16), preferred_element_type=jnp.float32)

    xf = x.reshape(B, d_in)
    h = jnp.maximum(bdot(xf, params["we1"]) + params["be1"], 0.0)
    h = jnp.maximum(bdot(h, params["we2"]) + params["be2"], 0.0)
    h = bdot(h, params["we3"]) + params["be3"]
    mu_ref = bdot(h, params["wmu"]) + params["bmu"]
    sp_in = bdot(h, params["wstd"]) + params["bstd"]
    std_ref = jnp.clip(jnp.maximum(sp_in, 0.0) + jnp.log(1.0 + jnp.exp(-jnp.abs(sp_in))),
                       1e-4, 5.0)
    z_ref = eps * std_ref + mu_ref
    d = jnp.maximum(bdot(z_ref, params["wd1"]) + params["bd1"], 0.0)
    d = jnp.maximum(bdot(d, params["wd2"]) + params["bd2"], 0.0)
    recon_ref = jax.nn.sigmoid(bdot(d, params["wd3"]) + params["bd3"])

    assert recon.shape == (B, d_in)
    assert mu.shape == (B, latent_size) and std.shape == (B, latent_size)
    np.testing.assert_allclose(np.asarray(mu), np.asarray(mu_ref), rtol=2e-3, atol=2e-3)
    np.testing.assert_allclose(np.asarray(std), np.asarray(std_ref), rtol=2e-3, atol=2e-3)
    np.testing.assert_allclose(np.asarray(recon), np.asarray(recon_ref), rtol=1e-2, atol=1e-2)

    print("KERNEL_OK")
</pallas_src>

<mosaic_0001>
module attributes {stable_mosaic.version = 11 : i64} {
  func.func @_fvae_kernel(%arg0: i32, %arg1: memref<16x1024xbf16, #tpu.memory_space<vmem>>, %arg2: memref<16x128xf32, #tpu.memory_space<vmem>>, %arg3: memref<1024x128xbf16, #tpu.memory_space<vmem>>, %arg4: memref<1x128xf32, #tpu.memory_space<vmem>>, %arg5: memref<128x128xbf16, #tpu.memory_space<vmem>>, %arg6: memref<1x128xf32, #tpu.memory_space<vmem>>, %arg7: memref<128x128xbf16, #tpu.memory_space<vmem>>, %arg8: memref<1x128xf32, #tpu.memory_space<vmem>>, %arg9: memref<128x256xbf16, #tpu.memory_space<vmem>>, %arg10: memref<1x256xf32, #tpu.memory_space<vmem>>, %arg11: memref<128x128xbf16, #tpu.memory_space<vmem>>, %arg12: memref<1x128xf32, #tpu.memory_space<vmem>>, %arg13: memref<128x128xbf16, #tpu.memory_space<vmem>>, %arg14: memref<1x128xf32, #tpu.memory_space<vmem>>, %arg15: memref<128x1024xbf16, #tpu.memory_space<vmem>>, %arg16: memref<1x1024xf32, #tpu.memory_space<vmem>>, %arg17: memref<16x1024xf32, #tpu.memory_space<vmem>>, %arg18: memref<16x128xf32, #tpu.memory_space<vmem>>, %arg19: memref<16x128xf32, #tpu.memory_space<vmem>>) attributes {dimension_semantics = [#tpu.dimension_semantics<parallel>], iteration_bounds = array<i64: 1>, scalar_prefetch = 0 : i64, scratch_operands = 0 : i64, tpu.core_type = #tpu.core_type<tc>, window_params = [{transform_indices = @transform_0, window_bounds = array<i64: 16, 1024>}, {transform_indices = @transform_1, window_bounds = array<i64: 16, 128>}, {pipeline_mode = #tpu.pipeline_mode<synchronous>, transform_indices = @transform_2, window_bounds = array<i64: 1024, 128>}, {pipeline_mode = #tpu.pipeline_mode<synchronous>, transform_indices = @transform_3, window_bounds = array<i64: 1, 128>}, {pipeline_mode = #tpu.pipeline_mode<synchronous>, transform_indices = @transform_4, window_bounds = array<i64: 128, 128>}, {pipeline_mode = #tpu.pipeline_mode<synchronous>, transform_indices = @transform_5, window_bounds = array<i64: 1, 128>}, {pipeline_mode = #tpu.pipeline_mode<synchronous>, transform_indices = @transform_6, window_bounds = array<i64: 128, 128>}, {pipeline_mode = #tpu.pipeline_mode<synchronous>, transform_indices = @transform_7, window_bounds = array<i64: 1, 128>}, {pipeline_mode = #tpu.pipeline_mode<synchronous>, transform_indices = @transform_8, window_bounds = array<i64: 128, 256>}, {pipeline_mode = #tpu.pipeline_mode<synchronous>, transform_indices = @transform_9, window_bounds = array<i64: 1, 256>}, {pipeline_mode = #tpu.pipeline_mode<synchronous>, transform_indices = @transform_10, window_bounds = array<i64: 128, 128>}, {pipeline_mode = #tpu.pipeline_mode<synchronous>, transform_indices = @transform_11, window_bounds = array<i64: 1, 128>}, {pipeline_mode = #tpu.pipeline_mode<synchronous>, transform_indices = @transform_12, window_bounds = array<i64: 128, 128>}, {pipeline_mode = #tpu.pipeline_mode<synchronous>, transform_indices = @transform_13, window_bounds = array<i64: 1, 128>}, {pipeline_mode = #tpu.pipeline_mode<synchronous>, transform_indices = @transform_14, window_bounds = array<i64: 128, 1024>}, {pipeline_mode = #tpu.pipeline_mode<synchronous>, transform_indices = @transform_15, window_bounds = array<i64: 1, 1024>}, {transform_indices = @transform_16, window_bounds = array<i64: 16, 1024>}, {transform_indices = @transform_17, window_bounds = array<i64: 16, 128>}, {transform_indices = @transform_18, window_bounds = array<i64: 16, 128>}]} {
    %c0 = arith.constant 0 : index
    %c0_0 = arith.constant 0 : index
    %0 = vector.load %arg1[%c0, %c0_0] : memref<16x1024xbf16, #tpu.memory_space<vmem>>, vector<16x1024xbf16>
    %c0_1 = arith.constant 0 : index
    %c0_2 = arith.constant 0 : index
    %1 = vector.load %arg3[%c0_1, %c0_2] : memref<1024x128xbf16, #tpu.memory_space<vmem>>, vector<1024x128xbf16>
    %cst = arith.constant dense<0.000000e+00> : vector<16x128xf32>
    %2 = tpu.matmul %0, %1, %cst {dimension_numbers = #tpu.dot_dimension_numbers<[1], [0], [0], [1], [0, 0, 1, 1], [], []>} : vector<16x1024xbf16>, vector<1024x128xbf16>, vector<16x128xf32> -> vector<16x128xf32>
    %c0_3 = arith.constant 0 : index
    %c0_4 = arith.constant 0 : index
    %3 = vector.load %arg4[%c0_3, %c0_4] : memref<1x128xf32, #tpu.memory_space<vmem>>, vector<1x128xf32>
    %4 = vector.broadcast %3 : vector<1x128xf32> to vector<16x128xf32>
    %5 = arith.addf %2, %4 : vector<16x128xf32>
    %cst_5 = arith.constant 0.000000e+00 : f32
    %6 = vector.broadcast %cst_5 : f32 to vector<16x128xf32>
    %7 = arith.maximumf %5, %6 : vector<16x128xf32>
    %8 = arith.truncf %7 : vector<16x128xf32> to vector<16x128xbf16>
    %c0_6 = arith.constant 0 : index
    %c0_7 = arith.constant 0 : index
    %9 = vector.load %arg5[%c0_6, %c0_7] : memref<128x128xbf16, #tpu.memory_space<vmem>>, vector<128x128xbf16>
    %cst_8 = arith.constant dense<0.000000e+00> : vector<16x128xf32>
    %10 = tpu.matmul %8, %9, %cst_8 {dimension_numbers = #tpu.dot_dimension_numbers<[1], [0], [0], [1], [0, 0, 1, 1], [], []>} : vector<16x128xbf16>, vector<128x128xbf16>, vector<16x128xf32> -> vector<16x128xf32>
    %c0_9 = arith.constant 0 : index
    %c0_10 = arith.constant 0 : index
    %11 = vector.load %arg6[%c0_9, %c0_10] : memref<1x128xf32, #tpu.memory_space<vmem>>, vector<1x128xf32>
    %12 = vector.broadcast %11 : vector<1x128xf32> to vector<16x128xf32>
    %13 = arith.addf %10, %12 : vector<16x128xf32>
    %cst_11 = arith.constant 0.000000e+00 : f32
    %14 = vector.broadcast %cst_11 : f32 to vector<16x128xf32>
    %15 = arith.maximumf %13, %14 : vector<16x128xf32>
    %16 = arith.truncf %15 : vector<16x128xf32> to vector<16x128xbf16>
    %c0_12 = arith.constant 0 : index
    %c0_13 = arith.constant 0 : index
    %17 = vector.load %arg7[%c0_12, %c0_13] : memref<128x128xbf16, #tpu.memory_space<vmem>>, vector<128x128xbf16>
    %cst_14 = arith.constant dense<0.000000e+00> : vector<16x128xf32>
    %18 = tpu.matmul %16, %17, %cst_14 {dimension_numbers = #tpu.dot_dimension_numbers<[1], [0], [0], [1], [0, 0, 1, 1], [], []>} : vector<16x128xbf16>, vector<128x128xbf16>, vector<16x128xf32> -> vector<16x128xf32>
    %c0_15 = arith.constant 0 : index
    %c0_16 = arith.constant 0 : index
    %19 = vector.load %arg8[%c0_15, %c0_16] : memref<1x128xf32, #tpu.memory_space<vmem>>, vector<1x128xf32>
    %20 = vector.broadcast %19 : vector<1x128xf32> to vector<16x128xf32>
    %21 = arith.addf %18, %20 : vector<16x128xf32>
    %22 = arith.truncf %21 : vector<16x128xf32> to vector<16x128xbf16>
    %c0_17 = arith.constant 0 : index
    %c0_18 = arith.constant 0 : index
    %23 = vector.load %arg9[%c0_17, %c0_18] : memref<128x256xbf16, #tpu.memory_space<vmem>>, vector<128x256xbf16>
    %cst_19 = arith.constant dense<0.000000e+00> : vector<16x256xf32>
    %24 = tpu.matmul %22, %23, %cst_19 {dimension_numbers = #tpu.dot_dimension_numbers<[1], [0], [0], [1], [0, 0, 1, 1], [], []>} : vector<16x128xbf16>, vector<128x256xbf16>, vector<16x256xf32> -> vector<16x256xf32>
    %c0_20 = arith.constant 0 : index
    %c0_21 = arith.constant 0 : index
    %25 = vector.load %arg10[%c0_20, %c0_21] : memref<1x256xf32, #tpu.memory_space<vmem>>, vector<1x256xf32>
    %26 = vector.broadcast %25 : vector<1x256xf32> to vector<16x256xf32>
    %27 = arith.addf %24, %26 : vector<16x256xf32>
    %28 = vector.extract_strided_slice %27 {offsets = [0, 0], sizes = [16, 128], strides = [1, 1]} : vector<16x256xf32> to vector<16x128xf32>
    %29 = vector.extract_strided_slice %27 {offsets = [0, 128], sizes = [16, 128], strides = [1, 1]} : vector<16x256xf32> to vector<16x128xf32>
    %cst_22 = arith.constant 0.000000e+00 : f32
    %30 = vector.broadcast %cst_22 : f32 to vector<16x128xf32>
    %31 = arith.maximumf %29, %30 : vector<16x128xf32>
    %32 = math.absf %29 : vector<16x128xf32>
    %cst_23 = arith.constant 0.000000e+00 : f32
    %33 = vector.broadcast %cst_23 : f32 to vector<16x128xf32>
    %34 = arith.subf %33, %32 : vector<16x128xf32>
    %35 = math.exp %34 : vector<16x128xf32>
    %cst_24 = arith.constant 1.000000e+00 : f32
    %36 = vector.broadcast %cst_24 : f32 to vector<16x128xf32>
    %37 = arith.addf %36, %35 : vector<16x128xf32>
    %38 = math.log %37 : vector<16x128xf32>
    %39 = arith.addf %31, %38 : vector<16x128xf32>
    %cst_25 = arith.constant 9.99999974E-5 : f32
    %40 = vector.broadcast %cst_25 : f32 to vector<16x128xf32>
    %41 = arith.maximumf %39, %40 : vector<16x128xf32>
    %cst_26 = arith.constant 5.000000e+00 : f32
    %42 = vector.broadcast %cst_26 : f32 to vector<16x128xf32>
    %43 = arith.minimumf %41, %42 : vector<16x128xf32>
    %c0_27 = arith.constant 0 : index
    %c0_28 = arith.constant 0 : index
    %44 = vector.load %arg2[%c0_27, %c0_28] : memref<16x128xf32, #tpu.memory_space<vmem>>, vector<16x128xf32>
    %45 = arith.mulf %44, %43 : vector<16x128xf32>
    %46 = arith.addf %45, %28 : vector<16x128xf32>
    %47 = arith.truncf %46 : vector<16x128xf32> to vector<16x128xbf16>
    %c0_29 = arith.constant 0 : index
    %c0_30 = arith.constant 0 : index
    %48 = vector.load %arg11[%c0_29, %c0_30] : memref<128x128xbf16, #tpu.memory_space<vmem>>, vector<128x128xbf16>
    %cst_31 = arith.constant dense<0.000000e+00> : vector<16x128xf32>
    %49 = tpu.matmul %47, %48, %cst_31 {dimension_numbers = #tpu.dot_dimension_numbers<[1], [0], [0], [1], [0, 0, 1, 1], [], []>} : vector<16x128xbf16>, vector<128x128xbf16>, vector<16x128xf32> -> vector<16x128xf32>
    %c0_32 = arith.constant 0 : index
    %c0_33 = arith.constant 0 : index
    %50 = vector.load %arg12[%c0_32, %c0_33] : memref<1x128xf32, #tpu.memory_space<vmem>>, vector<1x128xf32>
    %51 = vector.broadcast %50 : vector<1x128xf32> to vector<16x128xf32>
    %52 = arith.addf %49, %51 : vector<16x128xf32>
    %cst_34 = arith.constant 0.000000e+00 : f32
    %53 = vector.broadcast %cst_34 : f32 to vector<16x128xf32>
    %54 = arith.maximumf %52, %53 : vector<16x128xf32>
    %55 = arith.truncf %54 : vector<16x128xf32> to vector<16x128xbf16>
    %c0_35 = arith.constant 0 : index
    %c0_36 = arith.constant 0 : index
    %56 = vector.load %arg13[%c0_35, %c0_36] : memref<128x128xbf16, #tpu.memory_space<vmem>>, vector<128x128xbf16>
    %cst_37 = arith.constant dense<0.000000e+00> : vector<16x128xf32>
    %57 = tpu.matmul %55, %56, %cst_37 {dimension_numbers = #tpu.dot_dimension_numbers<[1], [0], [0], [1], [0, 0, 1, 1], [], []>} : vector<16x128xbf16>, vector<128x128xbf16>, vector<16x128xf32> -> vector<16x128xf32>
    %c0_38 = arith.constant 0 : index
    %c0_39 = arith.constant 0 : index
    %58 = vector.load %arg14[%c0_38, %c0_39] : memref<1x128xf32, #tpu.memory_space<vmem>>, vector<1x128xf32>
    %59 = vector.broadcast %58 : vector<1x128xf32> to vector<16x128xf32>
    %60 = arith.addf %57, %59 : vector<16x128xf32>
    %cst_40 = arith.constant 0.000000e+00 : f32
    %61 = vector.broadcast %cst_40 : f32 to vector<16x128xf32>
    %62 = arith.maximumf %60, %61 : vector<16x128xf32>
    %63 = arith.truncf %62 : vector<16x128xf32> to vector<16x128xbf16>
    %c0_41 = arith.constant 0 : index
    %c0_42 = arith.constant 0 : index
    %64 = vector.load %arg15[%c0_41, %c0_42] : memref<128x1024xbf16, #tpu.memory_space<vmem>>, vector<128x1024xbf16>
    %cst_43 = arith.constant dense<0.000000e+00> : vector<16x1024xf32>
    %65 = tpu.matmul %63, %64, %cst_43 {dimension_numbers = #tpu.dot_dimension_numbers<[1], [0], [0], [1], [0, 0, 1, 1], [], []>} : vector<16x128xbf16>, vector<128x1024xbf16>, vector<16x1024xf32> -> vector<16x1024xf32>
    %c0_44 = arith.constant 0 : index
    %c0_45 = arith.constant 0 : index
    %66 = vector.load %arg16[%c0_44, %c0_45] : memref<1x1024xf32, #tpu.memory_space<vmem>>, vector<1x1024xf32>
    %67 = vector.broadcast %66 : vector<1x1024xf32> to vector<16x1024xf32>
    %68 = arith.addf %65, %67 : vector<16x1024xf32>
    %cst_46 = arith.constant 0.000000e+00 : f32
    %69 = vector.broadcast %cst_46 : f32 to vector<16x1024xf32>
    %70 = arith.subf %69, %68 : vector<16x1024xf32>
    %71 = math.exp %70 : vector<16x1024xf32>
    %cst_47 = arith.constant 1.000000e+00 : f32
    %72 = vector.broadcast %cst_47 : f32 to vector<16x1024xf32>
    %73 = arith.addf %72, %71 : vector<16x1024xf32>
    %74 = tpu.reciprocal %73 {approx = true} : vector<16x1024xf32> -> vector<16x1024xf32>
    %c0_48 = arith.constant 0 : index
    %c0_49 = arith.constant 0 : index
    %75 = vector.load %arg17[%c0_48, %c0_49] : memref<16x1024xf32, #tpu.memory_space<vmem>>, vector<16x1024xf32>
    tpu.vector_store %arg17[%c0_48, %c0_49], %74 {strides = array<i32>} : memref<16x1024xf32, #tpu.memory_space<vmem>>, vector<16x1024xf32>,
    %c0_50 = arith.constant 0 : index
    %c0_51 = arith.constant 0 : index
    %76 = vector.load %arg18[%c0_50, %c0_51] : memref<16x128xf32, #tpu.memory_space<vmem>>, vector<16x128xf32>
    tpu.vector_store %arg18[%c0_50, %c0_51], %28 {strides = array<i32>} : memref<16x128xf32, #tpu.memory_space<vmem>>, vector<16x128xf32>,
    %c0_52 = arith.constant 0 : index
    %c0_53 = arith.constant 0 : index
    %77 = vector.load %arg19[%c0_52, %c0_53] : memref<16x128xf32, #tpu.memory_space<vmem>>, vector<16x128xf32>
    tpu.vector_store %arg19[%c0_52, %c0_53], %43 {strides = array<i32>} : memref<16x128xf32, #tpu.memory_space<vmem>>, vector<16x128xf32>,
    return
  }
  func.func @transform_0(%arg0: i32) -> (i32, i32) {
    %c0_i32 = arith.constant 0 : i32
    %c0_i32_0 = arith.constant 0 : i32
    return %arg0, %c0_i32 : i32, i32
  }
  func.func @transform_1(%arg0: i32) -> (i32, i32) {
    %c0_i32 = arith.constant 0 : i32
    %c0_i32_0 = arith.constant 0 : i32
    return %arg0, %c0_i32 : i32, i32
  }
  func.func @transform_2(%arg0: i32) -> (i32, i32) {
    %c0_i32 = arith.constant 0 : i32
    %c0_i32_0 = arith.constant 0 : i32
    %c0_i32_1 = arith.constant 0 : i32
    return %c0_i32, %c0_i32_0 : i32, i32
  }
  func.func @transform_3(%arg0: i32) -> (i32, i32) {
    %c0_i32 = arith.constant 0 : i32
    %c0_i32_0 = arith.constant 0 : i32
    %c0_i32_1 = arith.constant 0 : i32
    return %c0_i32, %c0_i32_0 : i32, i32
  }
  func.func @transform_4(%arg0: i32) -> (i32, i32) {
    %c0_i32 = arith.constant 0 : i32
    %c0_i32_0 = arith.constant 0 : i32
    %c0_i32_1 = arith.constant 0 : i32
    return %c0_i32, %c0_i32_0 : i32, i32
  }
  func.func @transform_5(%arg0: i32) -> (i32, i32) {
    %c0_i32 = arith.constant 0 : i32
    %c0_i32_0 = arith.constant 0 : i32
    %c0_i32_1 = arith.constant 0 : i32
    return %c0_i32, %c0_i32_0 : i32, i32
  }
  func.func @transform_6(%arg0: i32) -> (i32, i32) {
    %c0_i32 = arith.constant 0 : i32
    %c0_i32_0 = arith.constant 0 : i32
    %c0_i32_1 = arith.constant 0 : i32
    return %c0_i32, %c0_i32_0 : i32, i32
  }
  func.func @transform_7(%arg0: i32) -> (i32, i32) {
    %c0_i32 = arith.constant 0 : i32
    %c0_i32_0 = arith.constant 0 : i32
    %c0_i32_1 = arith.constant 0 : i32
    return %c0_i32, %c0_i32_0 : i32, i32
  }
  func.func @transform_8(%arg0: i32) -> (i32, i32) {
    %c0_i32 = arith.constant 0 : i32
    %c0_i32_0 = arith.constant 0 : i32
    %c0_i32_1 = arith.constant 0 : i32
    return %c0_i32, %c0_i32_0 : i32, i32
  }
  func.func @transform_9(%arg0: i32) -> (i32, i32) {
    %c0_i32 = arith.constant 0 : i32
    %c0_i32_0 = arith.constant 0 : i32
    %c0_i32_1 = arith.constant 0 : i32
    return %c0_i32, %c0_i32_0 : i32, i32
  }
  func.func @transform_10(%arg0: i32) -> (i32, i32) {
    %c0_i32 = arith.constant 0 : i32
    %c0_i32_0 = arith.constant 0 : i32
    %c0_i32_1 = arith.constant 0 : i32
    return %c0_i32, %c0_i32_0 : i32, i32
  }
  func.func @transform_11(%arg0: i32) -> (i32, i32) {
    %c0_i32 = arith.constant 0 : i32
    %c0_i32_0 = arith.constant 0 : i32
    %c0_i32_1 = arith.constant 0 : i32
    return %c0_i32, %c0_i32_0 : i32, i32
  }
  func.func @transform_12(%arg0: i32) -> (i32, i32) {
    %c0_i32 = arith.constant 0 : i32
    %c0_i32_0 = arith.constant 0 : i32
    %c0_i32_1 = arith.constant 0 : i32
    return %c0_i32, %c0_i32_0 : i32, i32
  }
  func.func @transform_13(%arg0: i32) -> (i32, i32) {
    %c0_i32 = arith.constant 0 : i32
    %c0_i32_0 = arith.constant 0 : i32
    %c0_i32_1 = arith.constant 0 : i32
    return %c0_i32, %c0_i32_0 : i32, i32
  }
  func.func @transform_14(%arg0: i32) -> (i32, i32) {
    %c0_i32 = arith.constant 0 : i32
    %c0_i32_0 = arith.constant 0 : i32
    %c0_i32_1 = arith.constant 0 : i32
    return %c0_i32, %c0_i32_0 : i32, i32
  }
  func.func @transform_15(%arg0: i32) -> (i32, i32) {
    %c0_i32 = arith.constant 0 : i32
    %c0_i32_0 = arith.constant 0 : i32
    %c0_i32_1 = arith.constant 0 : i32
    return %c0_i32, %c0_i32_0 : i32, i32
  }
  func.func @transform_16(%arg0: i32) -> (i32, i32) {
    %c0_i32 = arith.constant 0 : i32
    %c0_i32_0 = arith.constant 0 : i32
    return %arg0, %c0_i32 : i32, i32
  }
  func.func @transform_17(%arg0: i32) -> (i32, i32) {
    %c0_i32 = arith.constant 0 : i32
    %c0_i32_0 = arith.constant 0 : i32
    return %arg0, %c0_i32 : i32, i32
  }
  func.func @transform_18(%arg0: i32) -> (i32, i32) {
    %c0_i32 = arith.constant 0 : i32
    %c0_i32_0 = arith.constant 0 : i32
    return %arg0, %c0_i32 : i32, i32
  }
}

</mosaic_0001>

<bundles_post_ra>
// kernel: tpu_custom_call.1
= control target key start
LH: loop header
LB: loop body
LE: loop exit
PB: predicated region body
PF: predicated region fallthrough
CT: control target
= control target key end

     0   :  { %s3583_s0 = inlined_call_operand.hbm [shape: bf16[16,1024], index: 0, kind: input, shape index: {}]   ;;  %s3584_s1 = inlined_call_operand.hbm [shape: f32[16,128], index: 1, kind: input, shape index: {}]   ;;  %s3585_s2 = inlined_call_operand.hbm [shape: bf16[1024,128], index: 2, kind: input, shape index: {}]   ;;  %s3586_s3 = inlined_call_operand.vmem [shape: f32[1,128], index: 3, kind: input, shape index: {}]   ;;  %s3587_s4 = inlined_call_operand.hbm [shape: bf16[128,128], index: 4, kind: input, shape index: {}]   ;;  %s3588_s5 = inlined_call_operand.vmem [shape: f32[1,128], index: 5, kind: input, shape index: {}]   ;;  %s3589_s6 = inlined_call_operand.hbm [shape: bf16[128,128], index: 6, kind: input, shape index: {}]   ;;  %s3590_s7 = inlined_call_operand.vmem [shape: f32[1,128], index: 7, kind: input, shape index: {}]   ;;  %s3591_s8 = inlined_call_operand.hbm [shape: bf16[128,256], index: 8, kind: input, shape index: {}]   ;;  %s3592_s9 = inlined_call_operand.vmem [shape: f32[1,256], index: 9, kind: input, shape index: {}]   ;;  %s3593_s10 = inlined_call_operand.hbm [shape: bf16[128,128], index: 10, kind: input, shape index: {}]   ;;  %s3594_s11 = inlined_call_operand.vmem [shape: f32[1,128], index: 11, kind: input, shape index: {}]   ;;  %s3595_s12 = inlined_call_operand.hbm [shape: bf16[128,128], index: 12, kind: input, shape index: {}]   ;;  %s3596_s13 = inlined_call_operand.vmem [shape: f32[1,128], index: 13, kind: input, shape index: {}]   ;;  %s3597_s14 = inlined_call_operand.hbm [shape: bf16[128,1024], index: 14, kind: input, shape index: {}]   ;;  %s3598_s15 = inlined_call_operand.vmem [shape: f32[1,1024], index: 15, kind: input, shape index: {}]   ;;  %s3599_s16 = inlined_call_operand.hbm [shape: f32[16,1024], index: 16, kind: output, shape index: {0}]   ;;  %s3600_s17 = inlined_call_operand.hbm [shape: f32[16,128], index: 17, kind: output, shape index: {1}]   ;;  %s3601_s18 = inlined_call_operand.hbm [shape: f32[16,128], index: 18, kind: output, shape index: {2}]  }
   0x1   :  { %3610 = sst [smem:[#allocation28_spill]] %s3583_s0 }
   0x2   :  { %3611 = sst [smem:[#allocation29_spill]] %s3584_s1 }
   0x3   :  { %3612 = sst [smem:[#allocation30_spill]] %s3585_s2 }
   0x4   :  { %3613 = sst [smem:[#allocation31_spill]] %s3598_s15 }
   0x5   :  { %3614 = sst [smem:[#allocation32_spill]] %s3599_s16 }
   0x6   :  { %24 = vsyncpa [#allocation3], 0 }
   0x7   :  { %25 = vsyncpa [#allocation6], 0 }
   0x8   :  { %26 = vsyncpa [#allocation9], 0 }
   0x9   :  { %27 = vsyncpa [#allocation12], 0 }
   0xa   :  { %28 = vsyncpa [#allocation15], 0 }
   0xb   :  { %29 = vsyncpa [#allocation4], 0 }
   0xc   :  { %30 = vsyncpa [#allocation19], 0  ;;  %s3188_s27 = smov [#allocation5]   ;;  %s3615_s0 = sld [smem:[#allocation29_spill]] }
   0xd   :  { %s48_s28 = sshll.u32 %s3188_s27, 4  ;;  %s49_s28 = int_to_ptr.vmem [resolvable:$true] %s48_s28 }
  0x12   :  { %s2910_s19 = scalar_lea.hbm %s3615_s0, 256 }
  0x13   :  { %p2911_p0 = scmp.ne.s32.totalorder %s3615_s0, %s2910_s19  ;;  %p2914_p1 = scmp.lt.u32.totalorder %s2910_s19, %s3615_s0 }
  0x15   :  { %p2916_p2 = pnand %p2914_p1, %p2911_p0 }
  0x17   :  { %2919 = shalt.err (!%p2916_p2)
}
  0x18   :  { %s2920_s2 = scalar_lea.vmem %s49_s28, 256  ;;  %p2925_p4 = scmp.lt.s32.totalorder %s49_s28, %s49_s28 }
  0x19   :  { %p2921_p3 = scmp.ne.s32.totalorder %s49_s28, %s2920_s2  ;;  %p2926_p5 = scmp.lt.s32.totalorder %s2920_s2, %s2920_s2 }
  0x1b   :  { %p2927_p6 = por %p2926_p5, %p2925_p4 }
  0x1d   :  { %p2928_p7 = pnand %p2927_p6, %p2921_p3 }
  0x1f   :  { %2931 = shalt.err (!%p2928_p7)
}
  0x20   :  { %s3606_s23 = smov 128   ;;  %s3608_s24 = smov 8  }
  0x21   :  { %54 = dma.hbm_to_vmem [thread:$0]  %s3615_s0, 256, %s49_s28, [#allocation6], %s3606_s23, %s3606_s23, %s3608_s24  }
  0x22   :  { %s3191_s27 = smov [#allocation8]   ;;  %s3192_s30 = smov [#allocation11]  }
  0x23   :  { %s74_s29 = sshll.u32 %s3191_s27, 4  ;;  %s102_s19 = sshll.u32 %s3192_s30, 4  ;;  %s75_s29 = int_to_ptr.vmem [resolvable:$true] %s74_s29  ;;  %s103_s19 = int_to_ptr.vmem [resolvable:$true] %s102_s19 }
  0x24   :  { %s2932_s21 = scalar_lea.hbm %s3587_s4, 1024 }
  0x25   :  { %p2933_p8 = scmp.ne.s32.totalorder %s3587_s4, %s2932_s21  ;;  %p2936_p9 = scmp.lt.u32.totalorder %s2932_s21, %s3587_s4 }
  0x27   :  { %p2938_p10 = pnand %p2936_p9, %p2933_p8 }
  0x29   :  { %2941 = shalt.err (!%p2938_p10)
}
  0x2a   :  { %s2942_s28 = scalar_lea.vmem %s75_s29, 1024  ;;  %p2947_p12 = scmp.lt.s32.totalorder %s75_s29, %s75_s29 }
  0x2b   :  { %p2943_p11 = scmp.ne.s32.totalorder %s75_s29, %s2942_s28  ;;  %p2948_p13 = scmp.lt.s32.totalorder %s2942_s28, %s2942_s28 }
  0x2d   :  { %p2949_p0 = por %p2948_p13, %p2947_p12 }
  0x2f   :  { %p2950_p1 = pnand %p2949_p0, %p2943_p11 }
  0x31   :  { %2953 = shalt.err (!%p2950_p1)
}
  0x32   :  { %s3193_s0 = smov 64   ;;  %s3194_s25 = smov 4  }
  0x33   :  { %80 = dma.hbm_to_vmem [thread:$0]  %s3587_s4, 1024, %s75_s29, [#allocation9], %s3193_s0, %s3193_s0, %s3194_s25  }
  0x34   :  { %s2954_s30 = scalar_lea.hbm %s3591_s8, 2048 }
  0x35   :  { %p2955_p2 = scmp.ne.s32.totalorder %s3591_s8, %s2954_s30  ;;  %p2958_p3 = scmp.lt.u32.totalorder %s2954_s30, %s3591_s8 }
  0x37   :  { %p2960_p4 = pnand %p2958_p3, %p2955_p2 }
  0x39   :  { %2963 = shalt.err (!%p2960_p4)
}
  0x3a   :  { %s2964_s2 = scalar_lea.vmem %s103_s19, 2048  ;;  %p2969_p6 = scmp.lt.s32.totalorder %s103_s19, %s103_s19 }
  0x3b   :  { %p2965_p5 = scmp.ne.s32.totalorder %s103_s19, %s2964_s2  ;;  %p2970_p7 = scmp.lt.s32.totalorder %s2964_s2, %s2964_s2 }
  0x3d   :  { %p2971_p8 = por %p2970_p7, %p2969_p6 }
  0x3f   :  { %p2972_p9 = pnand %p2971_p8, %p2965_p5 }
  0x41   :  { %2975 = shalt.err (!%p2972_p9)
}
  0x42   :  { %108 = dma.hbm_to_vmem [thread:$0]  %s3591_s8, 2048, %s103_s19, [#allocation12], %s3606_s23, %s3606_s23, %s3608_s24  }
  0x43   :  { %s3195_s28 = smov [#allocation14]   ;;  %s3196_s27 = smov [#allocation2]  }
  0x44   :  { %s130_s26 = sshll.u32 %s3195_s28, 4  ;;  %s36_s15 = sshll.u32 %s3196_s27, 4  ;;  %s131_s26 = int_to_ptr.vmem [resolvable:$true] %s130_s26  ;;  %s37_s15 = int_to_ptr.vmem [resolvable:$true] %s36_s15 }
  0x45   :  { %s2976_s1 = scalar_lea.hbm %s3595_s12, 1024 }
  0x46   :  { %p2977_p10 = scmp.ne.s32.totalorder %s3595_s12, %s2976_s1  ;;  %p2980_p11 = scmp.lt.u32.totalorder %s2976_s1, %s3595_s12 }
  0x48   :  { %p2982_p12 = pnand %p2980_p11, %p2977_p10 }
  0x4a   :  { %2985 = shalt.err (!%p2982_p12)
}
  0x4b   :  { %s2986_s8 = scalar_lea.vmem %s131_s26, 1024  ;;  %p2991_p0 = scmp.lt.s32.totalorder %s131_s26, %s131_s26 }
  0x4c   :  { %p2987_p13 = scmp.ne.s32.totalorder %s131_s26, %s2986_s8  ;;  %p2992_p1 = scmp.lt.s32.totalorder %s2986_s8, %s2986_s8 }
  0x4e   :  { %p2993_p2 = por %p2992_p1, %p2991_p0 }
  0x50   :  { %p2994_p3 = pnand %p2993_p2, %p2987_p13 }
  0x52   :  { %2997 = shalt.err (!%p2994_p3)
}
  0x53   :  { %136 = dma.hbm_to_vmem [thread:$0]  %s3595_s12, 1024, %s131_s26, [#allocation15], %s3193_s0, %s3193_s0, %s3194_s25  }
  0x54   :  { %s3616_s27 = sld [smem:[#allocation28_spill]] }
  0x5a   :  { %s2998_s16 = scalar_lea.hbm %s3616_s27, 1024 }
  0x5b   :  { %p2999_p4 = scmp.ne.s32.totalorder %s3616_s27, %s2998_s16  ;;  %p3002_p5 = scmp.lt.u32.totalorder %s2998_s16, %s3616_s27 }
  0x5d   :  { %p3004_p6 = pnand %p3002_p5, %p2999_p4 }
  0x5f   :  { %3007 = shalt.err (!%p3004_p6)
}
  0x60   :  { %s3008_s22 = scalar_lea.vmem %s37_s15, 1024  ;;  %p3013_p8 = scmp.lt.s32.totalorder %s37_s15, %s37_s15 }
  0x61   :  { %p3009_p7 = scmp.ne.s32.totalorder %s37_s15, %s3008_s22  ;;  %p3014_p9 = scmp.lt.s32.totalorder %s3008_s22, %s3008_s22 }
  0x63   :  { %p3015_p10 = por %p3014_p9, %p3013_p8 }
  0x65   :  { %p3016_p11 = pnand %p3015_p10, %p3009_p7 }
  0x67   :  { %3019 = shalt.err (!%p3016_p11)
}
  0x68   :  { %s3197_s12 = smov 512   ;;  %s3198_s26 = smov 32  }
  0x69   :  { %42 = dma.hbm_to_vmem [thread:$0]  %s3616_s27, 1024, %s37_s15, [#allocation3], %s3197_s12, %s3197_s12, %s3198_s26  }
  0x6a   :  { %s3199_s19 = smov [#allocation7]   ;;  %s3200_s29 = smov [#allocation10]  }
  0x6b   :  { %s60_s4 = sshll.u32 %s3199_s19, 4  ;;  %s88_s28 = sshll.u32 %s3200_s29, 4  ;;  %s61_s4 = int_to_ptr.vmem [resolvable:$true] %s60_s4  ;;  %s89_s28 = int_to_ptr.vmem [resolvable:$true] %s88_s28 }
  0x6c   :  { %s3617_s1 = sld [smem:[#allocation30_spill]] }
  0x72   :  { %s3020_s20 = scalar_lea.hbm %s3617_s1, 8192 }
  0x73   :  { %p3021_p12 = scmp.ne.s32.totalorder %s3617_s1, %s3020_s20  ;;  %p3024_p13 = scmp.lt.u32.totalorder %s3020_s20, %s3617_s1 }
  0x75   :  { %p3026_p0 = pnand %p3024_p13, %p3021_p12 }
  0x77   :  { %3029 = shalt.err (!%p3026_p0)
}
  0x78   :  { %s3030_s15 = scalar_lea.vmem %s61_s4, 8192  ;;  %p3035_p2 = scmp.lt.s32.totalorder %s61_s4, %s61_s4 }
  0x79   :  { %p3031_p1 = scmp.ne.s32.totalorder %s61_s4, %s3030_s15  ;;  %p3036_p3 = scmp.lt.s32.totalorder %s3030_s15, %s3030_s15 }
  0x7b   :  { %p3037_p4 = por %p3036_p3, %p3035_p2 }
  0x7d   :  { %p3038_p5 = pnand %p3037_p4, %p3031_p1 }
  0x7f   :  { %3041 = shalt.err (!%p3038_p5)
}
  0x80   :  { %66 = dma.hbm_to_vmem [thread:$0]  %s3617_s1, 8192, %s61_s4, [#allocation6], %s3193_s0, %s3193_s0, %s3194_s25  }
  0x81   :  { %s3042_s24 = scalar_lea.hbm %s3589_s6, 1024 }
  0x82   :  { %p3043_p6 = scmp.ne.s32.totalorder %s3589_s6, %s3042_s24  ;;  %p3046_p7 = scmp.lt.u32.totalorder %s3042_s24, %s3589_s6 }
  0x84   :  { %p3048_p8 = pnand %p3046_p7, %p3043_p6 }
  0x86   :  { %3051 = shalt.err (!%p3048_p8)
}
  0x87   :  { %s3052_s20 = scalar_lea.vmem %s89_s28, 1024  ;;  %p3057_p10 = scmp.lt.s32.totalorder %s89_s28, %s89_s28 }
  0x88   :  { %p3053_p9 = scmp.ne.s32.totalorder %s89_s28, %s3052_s20  ;;  %p3058_p11 = scmp.lt.s32.totalorder %s3052_s20, %s3052_s20 }
  0x8a   :  { %p3059_p12 = por %p3058_p11, %p3057_p10 }
  0x8c   :  { %p3060_p13 = pnand %p3059_p12, %p3053_p9 }
  0x8e   :  { %3063 = shalt.err (!%p3060_p13)
}
  0x8f   :  { %94 = dma.hbm_to_vmem [thread:$0]  %s3589_s6, 1024, %s89_s28, [#allocation9], %s3193_s0, %s3193_s0, %s3194_s25  }
  0x90   :  { %s3201_s21 = smov [#allocation13]   ;;  %s3202_s15 = smov [#allocation16]  }
  0x91   :  { %s116_s22 = sshll.u32 %s3201_s21, 4  ;;  %s144_s27 = sshll.u32 %s3202_s15, 4  ;;  %s117_s22 = int_to_ptr.vmem [resolvable:$true] %s116_s22  ;;  %s145_s27 = int_to_ptr.vmem [resolvable:$true] %s144_s27 }
  0x92   :  { %s3064_s23 = scalar_lea.hbm %s3593_s10, 1024 }
  0x93   :  { %p3065_p0 = scmp.ne.s32.totalorder %s3593_s10, %s3064_s23  ;;  %p3068_p1 = scmp.lt.u32.totalorder %s3064_s23, %s3593_s10 }
  0x95   :  { %p3070_p2 = pnand %p3068_p1, %p3065_p0 }
  0x97   :  { %3073 = shalt.err (!%p3070_p2)
}
  0x98   :  { %s3074_s6 = scalar_lea.vmem %s117_s22, 1024  ;;  %p3079_p4 = scmp.lt.s32.totalorder %s117_s22, %s117_s22 }
  0x99   :  { %p3075_p3 = scmp.ne.s32.totalorder %s117_s22, %s3074_s6  ;;  %p3080_p5 = scmp.lt.s32.totalorder %s3074_s6, %s3074_s6 }
  0x9b   :  { %p3081_p6 = por %p3080_p5, %p3079_p4 }
  0x9d   :  { %p3082_p7 = pnand %p3081_p6, %p3075_p3 }
  0x9f   :  { %3085 = shalt.err (!%p3082_p7)
}
  0xa0   :  { %122 = dma.hbm_to_vmem [thread:$0]  %s3593_s10, 1024, %s117_s22, [#allocation12], %s3193_s0, %s3193_s0, %s3194_s25  }
  0xa1   :  { %s3086_s1 = scalar_lea.hbm %s3597_s14, 8192 }
  0xa2   :  { %p3087_p8 = scmp.ne.s32.totalorder %s3597_s14, %s3086_s1  ;;  %p3090_p9 = scmp.lt.u32.totalorder %s3086_s1, %s3597_s14 }
  0xa4   :  { %p3092_p10 = pnand %p3090_p9, %p3087_p8 }
  0xa6   :  { %3095 = shalt.err (!%p3092_p10)
}
  0xa7   :  { %s3096_s23 = scalar_lea.vmem %s145_s27, 8192  ;;  %p3101_p12 = scmp.lt.s32.totalorder %s145_s27, %s145_s27 }
  0xa8   :  { %p3097_p11 = scmp.ne.s32.totalorder %s145_s27, %s3096_s23  ;;  %p3102_p13 = scmp.lt.s32.totalorder %s3096_s23, %s3096_s23 }
  0xaa   :  { %p3103_p0 = por %p3102_p13, %p3101_p12 }
  0xac   :  { %p3104_p1 = pnand %p3103_p0, %p3097_p11 }
  0xae   :  { %3107 = shalt.err (!%p3104_p1)
}
  0xaf   :  { %150 = dma.hbm_to_vmem [thread:$0]  %s3597_s14, 8192, %s145_s27, [#allocation15], %s3197_s12, %s3197_s12, %s3198_s26  }
  0xb0   :  { %3174 = dma.done.wait [#allocation3], 1024  }
  0xb1   :  { %3175 = vsyncadd [#allocation3], 4294966272 }
  0xb2   :  { %3176 = dma.done.wait [#allocation6], 8448  }
  0xb3   :  { %3177 = vsyncadd [#allocation6], 4294958848 }
  0xb4   :  { %3178 = dma.done.wait [#allocation9], 2048  }
  0xb5   :  { %3179 = vsyncadd [#allocation9], 4294965248 }
  0xb6   :  { %3180 = dma.done.wait [#allocation12], 3072  }
  0xb7   :  { %3181 = vsyncadd [#allocation12], 4294964224 }
  0xb8   :  { %3182 = dma.done.wait [#allocation15], 9216  }
  0xb9   :  { %3183 = vsyncadd [#allocation15], 4294958080  ;;  %v2718_v0 = vld [vmem:[#allocation7 + $0x40] sm:$0xff]   ;;  %v2722_v4 = vld [vmem:[#allocation7 + $0x48] sm:$0xff]   ;;  %vm3204_vm0 = vmmov 0  }
  0xba   :  { %v2719_v1 = vld [vmem:[#allocation7 + $0xc0] sm:$0xff]   ;;  %2492 = vmatprep.subr.bf16.mxu0 %v2718_v0  ;;  %v2723_v5 = vld [vmem:[#allocation7 + $0xc8] sm:$0xff]   ;;  %v2726_v8 = vld [vmem:[#allocation7 + $0x50] sm:$0xff]  }
  0xbb   :  { %v2720_v2 = vld [vmem:[#allocation7] sm:$0xff]   ;;  %2514 = vmatprep.subr.bf16.mxu1 %v2719_v1  ;;  %v2724_v6 = vld [vmem:[#allocation7 + $0x8] sm:$0xff]   ;;  %v2727_v9 = vld [vmem:[#allocation7 + $0xd0] sm:$0xff]  }
  0xbc   :  { %v2721_v3 = vld [vmem:[#allocation7 + $0x80] sm:$0xff]   ;;  %2493 = vmatpush3.bf16.msra.mxu0 %v2720_v2  ;;  %v2725_v7 = vld [vmem:[#allocation7 + $0x88] sm:$0xff]   ;;  %v2728_v10 = vld [vmem:[#allocation7 + $0x10] sm:$0xff]  }
  0xbd   :  { %2515 = vmatpush3.bf16.msra.mxu1 %v2721_v3  ;;  %2494 = vmatprep.subr.bf16.mxu0 %v2722_v4  ;;  %v2729_v11 = vld [vmem:[#allocation7 + $0x90] sm:$0xff]   ;;  %v2730_v12 = vld [vmem:[#allocation7 + $0x58] sm:$0xff]   ;;  %v2734_v16 = vld [vmem:[#allocation7 + $0x60] sm:$0xff]  }
  0xbe   :  { %2516 = vmatprep.subr.bf16.mxu1 %v2723_v5  ;;  %v2731_v13 = vld [vmem:[#allocation7 + $0xd8] sm:$0xff]   ;;  %v2735_v17 = vld [vmem:[#allocation7 + $0xe0] sm:$0xff]   ;;  %v2738_v20 = vld [vmem:[#allocation7 + $0x68] sm:$0xff]  }
  0xbf   :  { %v2732_v14 = vld [vmem:[#allocation7 + $0x18] sm:$0xff]   ;;  %v2736_v18 = vld [vmem:[#allocation7 + $0x20] sm:$0xff]   ;;  %v2739_v21 = vld [vmem:[#allocation7 + $0xe8] sm:$0xff]  }
  0xc0   :  { %2495 = vmatpush3.bf16.msra.mxu0 %v2724_v6  ;;  %v2733_v15 = vld [vmem:[#allocation7 + $0x98] sm:$0xff]   ;;  %v2737_v19 = vld [vmem:[#allocation7 + $0xa0] sm:$0xff]   ;;  %v2740_v22 = vld [vmem:[#allocation7 + $0x28] sm:$0xff]  }
  0xc1   :  { %2517 = vmatpush3.bf16.msra.mxu1 %v2725_v7  ;;  %2496 = vmatprep.subr.bf16.mxu0 %v2726_v8  ;;  %v2741_v23 = vld [vmem:[#allocation7 + $0xa8] sm:$0xff]   ;;  %v2742_v24 = vld [vmem:[#allocation7 + $0x70] sm:$0xff]   ;;  %v2746_v28 = vld [vmem:[#allocation7 + $0x78] sm:$0xff]  }
  0xc2   :  { %2518 = vmatprep.subr.bf16.mxu1 %v2727_v9  ;;  %v2743_v25 = vld [vmem:[#allocation7 + $0xf0] sm:$0xff]   ;;  %v2747_v29 = vld [vmem:[#allocation7 + $0xf8] sm:$0xff]   ;;  %v2750_v40 = vld [vmem:[#allocation7 + $0x140] sm:$0xff]  }
  0xc3   :  { %v2744_v26 = vld [vmem:[#allocation7 + $0x30] sm:$0xff]   ;;  %v2748_v30 = vld [vmem:[#allocation7 + $0x38] sm:$0xff]   ;;  %v2751_v41 = vld [vmem:[#allocation7 + $0x1c0] sm:$0xff]  }
  0xc4   :  { %2497 = vmatpush3.bf16.msra.mxu0 %v2728_v10  ;;  %v2745_v27 = vld [vmem:[#allocation7 + $0xb0] sm:$0xff]   ;;  %v2749_v31 = vld [vmem:[#allocation7 + $0xb8] sm:$0xff]   ;;  %v2752_v42 = vld [vmem:[#allocation7 + $0x100] sm:$0xff]  }
  0xc5   :  { %2519 = vmatpush3.bf16.msra.mxu1 %v2729_v11  ;;  %2498 = vmatprep.subr.bf16.mxu0 %v2730_v12  ;;  %v181_v32 = vld [vmem:[#allocation2] sm:$0xff]  ;;  %v182_v34 = vld [vmem:[#allocation2 + $0x8] sm:$0xff]  ;;  %v2753_v43 = vld [vmem:[#allocation7 + $0x180] sm:$0xff]  }
  0xc6   :  { %2520 = vmatprep.subr.bf16.mxu1 %v2731_v13  ;;  %v185_v33 = vld [vmem:[#allocation2 + $0x20] sm:$0xff]  ;;  %v186_v37 = vld [vmem:[#allocation2 + $0x28] sm:$0xff]  ;;  %v2754_v44 = vld [vmem:[#allocation7 + $0x148] sm:$0xff]  }
  0xc7   :  { %v2304_v35 = vcombine.low %v181_v32, %v185_v33  ;;  %v2305_v36 = vcombine.high %v181_v32, %v185_v33  ;;  %v2306_v38 = vcombine.low %v182_v34, %v186_v37  ;;  %v2307_v39 = vcombine.high %v182_v34, %v186_v37  ;;  %v2755_v45 = vld [vmem:[#allocation7 + $0x1c8] sm:$0xff]   ;;  %v2758_v48 = vld [vmem:[#allocation7 + $0x150] sm:$0xff]   ;;  %v2762_v52 = vld [vmem:[#allocation7 + $0x158] sm:$0xff]  }
  0xc8   :  { %2499 = vmatpush3.bf16.msra.mxu0 %v2732_v14  ;;  %v2756_v46 = vld [vmem:[#allocation7 + $0x108] sm:$0xff]   ;;  %v2759_v49 = vld [vmem:[#allocation7 + $0x1d0] sm:$0xff]   ;;  %v2763_v53 = vld [vmem:[#allocation7 + $0x1d8] sm:$0xff]  }
  0xc9   :  { %2521 = vmatpush3.bf16.msra.mxu1 %v2733_v15  ;;  %2500 = vmatprep.subr.bf16.mxu0 %v2734_v16  ;;  %v2757_v47 = vld [vmem:[#allocation7 + $0x188] sm:$0xff]   ;;  %v2760_v50 = vld [vmem:[#allocation7 + $0x110] sm:$0xff]   ;;  %v2764_v54 = vld [vmem:[#allocation7 + $0x118] sm:$0xff]  }
  0xca   :  { %2522 = vmatprep.subr.bf16.mxu1 %v2735_v17  ;;  %780 = vmatprep.mubr.bf16.mxu0 %v2305_v36  ;;  %v2761_v51 = vld [vmem:[#allocation7 + $0x190] sm:$0xff]   ;;  %v2765_v55 = vld [vmem:[#allocation7 + $0x198] sm:$0xff]   ;;  %v2766_v56 = vld [vmem:[#allocation7 + $0x160] sm:$0xff]   ;;  %v3203_v17 = vmov 0.0  }
  0xcb   :  { %821 = vmatprep.mubr.bf16.mxu1 %v2307_v39  ;;  %v2767_v57 = vld [vmem:[#allocation7 + $0x1e0] sm:$0xff]   ;;  %v2770_v60 = vld [vmem:[#allocation7 + $0x168] sm:$0xff]   ;;  %v2774_v0 = vld [vmem:[#allocation7 + $0x170] sm:$0xff]  }
  0xcc   :  { %2501 = vmatpush3.bf16.msra.mxu0 %v2736_v18  ;;  %v2768_v58 = vld [vmem:[#allocation7 + $0x120] sm:$0xff]   ;;  %v2771_v61 = vld [vmem:[#allocation7 + $0x1e8] sm:$0xff]   ;;  %v2775_v1 = vld [vmem:[#allocation7 + $0x1f0] sm:$0xff]  }
  0xcd   :  { %2523 = vmatpush3.bf16.msra.mxu1 %v2737_v19  ;;  %2502 = vmatprep.subr.bf16.mxu0 %v2738_v20  ;;  %v2769_v59 = vld [vmem:[#allocation7 + $0x1a0] sm:$0xff]   ;;  %v2772_v62 = vld [vmem:[#allocation7 + $0x128] sm:$0xff]   ;;  %v2776_v2 = vld [vmem:[#allocation7 + $0x130] sm:$0xff]  }
  0xce   :  { %2524 = vmatprep.subr.bf16.mxu1 %v2739_v21  ;;  %v2773_v63 = vld [vmem:[#allocation7 + $0x1a8] sm:$0xff]   ;;  %v2777_v3 = vld [vmem:[#allocation7 + $0x1b0] sm:$0xff]   ;;  %v2778_v4 = vld [vmem:[#allocation7 + $0x178] sm:$0xff]  }
  0xcf   :  { %v2779_v5 = vld [vmem:[#allocation7 + $0x1f8] sm:$0xff]   ;;  %v183_v8 = vld [vmem:[#allocation2 + $0x10] sm:$0xff]  ;;  %v184_v12 = vld [vmem:[#allocation2 + $0x18] sm:$0xff] }
  0xd0   :  { %2503 = vmatpush3.bf16.msra.mxu0 %v2740_v22  ;;  %v2780_v6 = vld [vmem:[#allocation7 + $0x138] sm:$0xff]   ;;  %v187_v9 = vld [vmem:[#allocation2 + $0x30] sm:$0xff]  ;;  %v188_v13 = vld [vmem:[#allocation2 + $0x38] sm:$0xff] }
  0xd1   :  { %2525 = vmatpush3.bf16.msra.mxu1 %v2741_v23  ;;  %2504 = vmatprep.subr.bf16.mxu0 %v2742_v24  ;;  %v2781_v7 = vld [vmem:[#allocation7 + $0x1b8] sm:$0xff]   ;;  %v2308_v10 = vcombine.low %v183_v8, %v187_v9  ;;  %v2309_v11 = vcombine.high %v183_v8, %v187_v9  ;;  %v2310_v14 = vcombine.low %v184_v12, %v188_v13  ;;  %v2782_v16 = vld [vmem:[#allocation8] sm:$0xff]   ;;  %v2783_v18 = vld [vmem:[#allocation8 + $0x8] sm:$0xff]  }
  0xd2   :  { %2526 = vmatprep.subr.bf16.mxu1 %v2743_v25  ;;  %v2311_v15 = vcombine.high %v184_v12, %v188_v13  ;;  %v2784_v19 = vld [vmem:[#allocation8 + $0x10] sm:$0xff]   ;;  %v2785_v20 = vld [vmem:[#allocation8 + $0x18] sm:$0xff]   ;;  %v2786_v21 = vld [vmem:[#allocation8 + $0x20] sm:$0xff]  }
  0xd3   :  { %v2787_v22 = vld [vmem:[#allocation8 + $0x28] sm:$0xff]   ;;  %v2788_v23 = vld [vmem:[#allocation8 + $0x30] sm:$0xff]   ;;  %v2789_v24 = vld [vmem:[#allocation8 + $0x38] sm:$0xff]  }
  0xd4   :  { %2505 = vmatpush3.bf16.msra.mxu0 %v2744_v26  ;;  %v2790_v25 = vld [vmem:[#allocation10] sm:$0xff]   ;;  %v2791_v26 = vld [vmem:[#allocation10 + $0x8] sm:$0xff]   ;;  %v2303_v33 = vld [vmem:[%s3586_s3] ss:$0 sm:$0xff] }
  0xd5   :  { %2527 = vmatpush3.bf16.msra.mxu1 %v2745_v27  ;;  %2506 = vmatprep.subr.bf16.mxu0 %v2746_v28  ;;  %v2792_v27 = vld [vmem:[#allocation10 + $0x10] sm:$0xff]   ;;  %v2793_v28 = vld [vmem:[#allocation10 + $0x18] sm:$0xff]   ;;  %v2806_v9 = vld [vmem:[#allocation11 + $0x24] ss:$8 sps:$4 sm:$0xff]  }
  0xd6   :  { %2528 = vmatprep.subr.bf16.mxu1 %v2747_v29  ;;  %v2794_v29 = vld [vmem:[#allocation10 + $0x20] sm:$0xff]   ;;  %v2801_v8 = vld [vmem:[#allocation11 + $0x10] ss:$8 sps:$4 sm:$0xff]  }
  0xd7   :  { %v2807_v12 = vld [vmem:[#allocation11 + $0x30] ss:$8 sps:$4 sm:$0xff]   ;;  %v2812_v13 = vld [vmem:[#allocation11 + $0x44] ss:$8 sps:$4 sm:$0xff]  }
  0xd8   :  { %2507 = vmatpush3.bf16.msra.mxu0 %v2748_v30  ;;  %v2795_v30 = vld [vmem:[#allocation10 + $0x28] sm:$0xff]  }
  0xd9   :  { %2529 = vmatpush3.bf16.msra.mxu1 %v2749_v31  ;;  %2536 = vmatprep.subr.bf16.mxu0 %v2750_v40 }
  0xda   :  { %2558 = vmatprep.subr.bf16.mxu1 %v2751_v41 }
  0xdb   :  { %781 = vmatmul.mubr.bf16.vlgmr.msra.gmra.mrb[0].mxu0 %v2304_v35 }
  0xdc   :  { %822 = vmatmul.mubr.bf16.vlgmr.msra.gmra.mrb[0].mxu1 %v2306_v38  ;;  %2537 = vmatpush3.bf16.msra.mxu0 %v2752_v42 }
  0xdd   :  { %2559 = vmatpush3.bf16.msra.mxu1 %v2753_v43  ;;  %2538 = vmatprep.subr.bf16.mxu0 %v2754_v44 }
  0xde   :  { %2560 = vmatprep.subr.bf16.mxu1 %v2755_v45  ;;  %862 = vmatprep.mubr.bf16.mxu0 %v2309_v11  ;;  %v2809_v11 = vld [vmem:[#allocation11 + $0x34] ss:$8 sps:$4 sm:$0xff]  }
  0xdf   :  { %903 = vmatprep.mubr.bf16.mxu1 %v2311_v15  ;;  %v2815_v15 = vld [vmem:[#allocation11 + $0x54] ss:$8 sps:$4 sm:$0xff]  }
  0xe0   :  { %2539 = vmatpush3.bf16.msra.mxu0 %v2756_v46 }
  0xe1   :  { %2561 = vmatpush3.bf16.msra.mxu1 %v2757_v47  ;;  %2540 = vmatprep.subr.bf16.mxu0 %v2758_v48 }
  0xe2   :  { %2562 = vmatprep.subr.bf16.mxu1 %v2759_v49 }
  0xe4   :  { %2541 = vmatpush3.bf16.msra.mxu0 %v2760_v50 }
  0xe5   :  { %2563 = vmatpush3.bf16.msra.mxu1 %v2761_v51  ;;  %2542 = vmatprep.subr.bf16.mxu0 %v2762_v52 }
  0xe6   :  { %2564 = vmatprep.subr.bf16.mxu1 %v2763_v53 }
  0xe8   :  { %2543 = vmatpush3.bf16.msra.mxu0 %v2764_v54 }
  0xe9   :  { %2565 = vmatpush3.bf16.msra.mxu1 %v2765_v55  ;;  %2544 = vmatprep.subr.bf16.mxu0 %v2766_v56 }
  0xea   :  { %2566 = vmatprep.subr.bf16.mxu1 %v2767_v57 }
  0xec   :  { %2545 = vmatpush3.bf16.msra.mxu0 %v2768_v58 }
  0xed   :  { %2567 = vmatpush3.bf16.msra.mxu1 %v2769_v59  ;;  %2546 = vmatprep.subr.bf16.mxu0 %v2770_v60 }
  0xee   :  { %2568 = vmatprep.subr.bf16.mxu1 %v2771_v61 }
  0xf0   :  { %2547 = vmatpush3.bf16.msra.mxu0 %v2772_v62 }
  0xf1   :  { %2569 = vmatpush3.bf16.msra.mxu1 %v2773_v63  ;;  %2548 = vmatprep.subr.bf16.mxu0 %v2774_v0 }
  0xf2   :  { %2570 = vmatprep.subr.bf16.mxu1 %v2775_v1 }
  0xf4   :  { %2549 = vmatpush3.bf16.msra.mxu0 %v2776_v2 }
  0xf5   :  { %2571 = vmatpush3.bf16.msra.mxu1 %v2777_v3  ;;  %2550 = vmatprep.subr.bf16.mxu0 %v2778_v4  ;;  %v2796_v3 = vld [vmem:[#allocation10 + $0x30] sm:$0xff]   ;;  %v2797_v4 = vld [vmem:[#allocation10 + $0x38] sm:$0xff]  }
  0xf6   :  { %2572 = vmatprep.subr.bf16.mxu1 %v2779_v5  ;;  %v2798_v5 = vld [vmem:[#allocation11] ss:$8 sps:$4 sm:$0xff]  }
  0xf8   :  { %2551 = vmatpush3.bf16.msra.mxu0 %v2780_v6  ;;  %v2800_v6 = vld [vmem:[#allocation11 + $0x4] ss:$8 sps:$4 sm:$0xff]  }
  0xf9   :  { %2573 = vmatpush3.bf16.msra.mxu1 %v2781_v7  ;;  %2616 = vmatprep.subr.bf16.mxu0 %v3203_v17  ;;  %v2803_v7 = vld [vmem:[#allocation11 + $0x14] ss:$8 sps:$4 sm:$0xff]  }
  0xfa   :  { %2636 = vmatprep.subr.bf16.mxu1 %v3203_v17 }
  0xfb   :  { %863 = vmatmul.mubr.bf16.vlgmr.msra.gmra.mrb[4].mxu0 %v2308_v10  ;;  %v2804_v10 = vld [vmem:[#allocation11 + $0x20] ss:$8 sps:$4 sm:$0xff]  }
  0xfc   :  { %904 = vmatmul.mubr.bf16.vlgmr.msra.gmra.mrb[4].mxu1 %v2310_v14  ;;  %2617 = vmatpush3.bf16.msra.mxu0 %v2782_v16  ;;  %v2810_v14 = vld [vmem:[#allocation11 + $0x40] ss:$8 sps:$4 sm:$0xff]   ;;  %v2813_v16 = vld [vmem:[#allocation11 + $0x50] ss:$8 sps:$4 sm:$0xff]  }
  0xfd   :  { %2618 = vmatprep.subr.bf16.mxu0 %v3203_v17  ;;  %2632 = vmatprep.mubr.msk.bf16.mxu0 %vm3204_vm0, %v3203_v17 }
  0xfe   :  { %2652 = vmatprep.mubr.msk.bf16.mxu1 %vm3204_vm0, %v3203_v17  ;;  %2637 = vmatpush3.bf16.msra.mxu1 %v2790_v25 }
  0xff   :  { %2638 = vmatprep.subr.bf16.mxu1 %v3203_v17 }
 0x100   :  { %2619 = vmatpush3.bf16.msra.mxu0 %v2783_v18  ;;  %v2818_v18 = vld [vmem:[#allocation11 + $0x64] ss:$8 sps:$4 sm:$0xff]  }
 0x101   :  { %2620 = vmatprep.subr.bf16.mxu0 %v3203_v17 }
 0x102   :  { %2639 = vmatpush3.bf16.msra.mxu1 %v2791_v26 }
 0x103   :  { %2640 = vmatprep.subr.bf16.mxu1 %v3203_v17 }
 0x104   :  { %2621 = vmatpush3.bf16.msra.mxu0 %v2784_v19  ;;  %v2816_v19 = vld [vmem:[#allocation11 + $0x60] ss:$8 sps:$4 sm:$0xff]  }
 0x105   :  { %2622 = vmatprep.subr.bf16.mxu0 %v3203_v17 }
 0x106   :  { %2641 = vmatpush3.bf16.msra.mxu1 %v2792_v27 }
 0x107   :  { %2642 = vmatprep.subr.bf16.mxu1 %v3203_v17 }
 0x108   :  { %2623 = vmatpush3.bf16.msra.mxu0 %v2785_v20  ;;  %v2376_v20 = vld [vmem:[%s3588_s5] ss:$0 sm:$0xff] }
 0x109   :  { %2624 = vmatprep.subr.bf16.mxu0 %v3203_v17 }
 0x10a   :  { %2643 = vmatpush3.bf16.msra.mxu1 %v2793_v28 }
 0x10b   :  { %2644 = vmatprep.subr.bf16.mxu1 %v3203_v17 }
 0x10c   :  { %2625 = vmatpush3.bf16.msra.mxu0 %v2786_v21 }
 0x10d   :  { %2626 = vmatprep.subr.bf16.mxu0 %v3203_v17 }
 0x10e   :  { %2645 = vmatpush3.bf16.msra.mxu1 %v2794_v29 }
 0x10f   :  { %2646 = vmatprep.subr.bf16.mxu1 %v3203_v17 }
 0x110   :  { %2627 = vmatpush3.bf16.msra.mxu0 %v2787_v22 }
 0x111   :  { %2628 = vmatprep.subr.bf16.mxu0 %v3203_v17 }
 0x112   :  { %2647 = vmatpush3.bf16.msra.mxu1 %v2795_v30  ;;  %v2821_v30 = vld [vmem:[#allocation11 + $0x74] ss:$8 sps:$4 sm:$0xff]  }
 0x113   :  { %2648 = vmatprep.subr.bf16.mxu1 %v3203_v17 }
 0x114   :  { %2629 = vmatpush3.bf16.msra.mxu0 %v2788_v23 }
 0x115   :  { %2630 = vmatprep.subr.bf16.mxu0 %v3203_v17 }
 0x116   :  { %2649 = vmatpush3.bf16.msra.mxu1 %v2796_v3 }
 0x117   :  { %2650 = vmatprep.subr.bf16.mxu1 %v3203_v17 }
 0x118   :  { %2631 = vmatpush3.bf16.msra.mxu0 %v2789_v24 }
 0x119   :  { %1251 = vmatprep.subr.bf16.mxu0 %v2800_v6 }
 0x11a   :  { %2651 = vmatpush3.bf16.msra.mxu1 %v2797_v4 }
 0x11b   :  { %2656 = vmatprep.subr.bf16.mxu1 %v3203_v17 }
 0x1ae   :  { %v2508_v31 = vpop.f32.mrb[0].mxu0 }
 0x1af   :  { %v2530_v32 = vpop.f32.mrb[0].mxu1  ;;  %v2509_v34 = vpop.f32.mrb[1].mxu0 }
 0x1b0   :  { %v2510_v35 = vadd.f32 %v2509_v34, %v2508_v31  ;;  %v2531_v36 = vpop.f32.mrb[1].mxu1  ;;  %v2511_v37 = vpop.f32.mrb[2].mxu0  ;;  %v2819_v31 = vld [vmem:[#allocation11 + $0x70] ss:$8 sps:$4 sm:$0xff]  }
 0x1b1   :  { %v2532_v38 = vadd.f32 %v2531_v36, %v2530_v32  ;;  %v2533_v39 = vpop.f32.mrb[2].mxu1  ;;  %v2512_v40 = vpop.f32.mrb[3].mxu0  ;;  %v3205_v32 = vmov 0  }
 0x1b2   :  { %v783_v41 = vadd.f32 %v2510_v35, %v2303_v33  ;;  %v2513_v42 = vadd.f32 %v2512_v40, %v2511_v37  ;;  %v2534_v43 = vpop.f32.mrb[3].mxu1 }
 0x1b3   :  { %v2535_v44 = vadd.f32 %v2534_v43, %v2533_v39  ;;  %v2824_v43 = vld [vmem:[#allocation13 + $0x10] sm:$0xff]  }
 0x1b4   :  { %v824_v45 = vadd.f32 %v2532_v38, %v783_v41  ;;  %v786_v46 = vadd.f32 %v2513_v42, %v2303_v33  ;;  %v2385_v33 = vld [vmem:[%s3590_s7] ss:$0 sm:$0xff]  ;;  %v2822_v41 = vld [vmem:[#allocation13] sm:$0xff]   ;;  %v2823_v42 = vld [vmem:[#allocation13 + $0x8] sm:$0xff]  }
 0x1b6   :  { %v827_v47 = vadd.f32 %v2535_v44, %v786_v46  ;;  %v2825_v44 = vld [vmem:[#allocation13 + $0x18] sm:$0xff]   ;;  %v2827_v46 = vld [vmem:[#allocation13 + $0x28] sm:$0xff]  }
 0x1ce   :  { %v2552_v48 = vpop.f32.mrb[4].mxu0 }
 0x1cf   :  { %v2574_v49 = vpop.f32.mrb[4].mxu1  ;;  %v2553_v50 = vpop.f32.mrb[5].mxu0 }
 0x1d0   :  { %v2554_v51 = vadd.f32 %v2553_v50, %v2552_v48  ;;  %v2575_v52 = vpop.f32.mrb[5].mxu1  ;;  %v2555_v53 = vpop.f32.mrb[6].mxu0  ;;  %v2829_v48 = vld [vmem:[#allocation13 + $0x38] sm:$0xff]   ;;  %v2831_v50 = vld [vmem:[#allocation14 + $0x8] sm:$0xff]  }
 0x1d1   :  { %v2576_v54 = vadd.f32 %v2575_v52, %v2574_v49  ;;  %v2577_v55 = vpop.f32.mrb[6].mxu1  ;;  %v2556_v56 = vpop.f32.mrb[7].mxu0  ;;  %v2830_v49 = vld [vmem:[#allocation14] sm:$0xff]   ;;  %v2833_v52 = vld [vmem:[#allocation14 + $0x18] sm:$0xff]  }
 0x1d2   :  { %v865_v57 = vadd.f32 %v2554_v51, %v824_v45  ;;  %v2557_v58 = vadd.f32 %v2556_v56, %v2555_v53  ;;  %v2578_v59 = vpop.f32.mrb[7].mxu1  ;;  %v2826_v45 = vld [vmem:[#allocation13 + $0x20] sm:$0xff]   ;;  %v2832_v51 = vld [vmem:[#allocation14 + $0x10] sm:$0xff]  }
 0x1d3   :  { %v2579_v60 = vadd.f32 %v2578_v59, %v2577_v55  ;;  %v2834_v53 = vld [vmem:[#allocation14 + $0x20] sm:$0xff]   ;;  %v1161_v55 = vlaneseq }
 0x1d4   :  { %v906_v61 = vadd.f32 %v2576_v54, %v865_v57  ;;  %v868_v62 = vadd.f32 %v2557_v58, %v827_v47  ;;  %v2828_v47 = vld [vmem:[#allocation13 + $0x30] sm:$0xff]   ;;  %v2835_v54 = vld [vmem:[#allocation14 + $0x28] sm:$0xff]  }
 0x1d5   :  { %v3489_v56 = vshrl.u32 %v1161_v55, 7  ;;  %v1159_v58 = vld [vmem:[%s3592_s9] sm:$0x3]  ;;  %v1581_v55 = vld [vmem:[#allocation16 + $0xe0] sm:$0xff] }
 0x1d6   :  { %v909_v63 = vadd.f32 %v2579_v60, %v868_v62  ;;  %v912_v0 = vmax.f32 %v906_v61, 0.0 }
 0x1d7   :  { %v1163_v57 = vsub.s32 0, %v3489_v56  ;;  %v1167_v59 = vsub.s32 1, %v3489_v56 }
 0x1d8   :  { %v913_v1 = vmax.f32 %v909_v63, 0.0 }
 0x1d9   :  { %v1164_v60 = vrot.slane %v1159_v58, %v1163_v57  ;;  %v1168_v61 = vrot.slane %v1159_v58, %v1167_v59 }
 0x1da   :  { %v914_v2 = vpack.c.bf16 %v913_v1, %v912_v0 }
 0x1dc   :  { %2633 = vmatmul.mubr.bf16.vlgmr.msra.gmra.mrb[8].mxu0 %v914_v2 }
 0x1dd   :  { %1252 = vmatpush1.bf16.msra.mxu0 %v2798_v5  ;;  %1283 = vmatprep.mubr.bf16.mxu0 %v3205_v32 }
 0x1de   :  { %1253 = vmatprep.subr.bf16.mxu0 %v2803_v7 }
 0x1e1   :  { %1254 = vmatpush1.bf16.msra.mxu0 %v2801_v8 }
 0x1e2   :  { %1255 = vmatprep.subr.bf16.mxu0 %v2806_v9 }
 0x1e5   :  { %1256 = vmatpush1.bf16.msra.mxu0 %v2804_v10 }
 0x1e6   :  { %1257 = vmatprep.subr.bf16.mxu0 %v2809_v11 }
 0x1e9   :  { %1258 = vmatpush1.bf16.msra.mxu0 %v2807_v12 }
 0x1ea   :  { %1259 = vmatprep.subr.bf16.mxu0 %v2812_v13 }
 0x1ed   :  { %1260 = vmatpush1.bf16.msra.mxu0 %v2810_v14 }
 0x1ee   :  { %1261 = vmatprep.subr.bf16.mxu0 %v2815_v15 }
 0x1f1   :  { %1262 = vmatpush1.bf16.msra.mxu0 %v2813_v16 }
 0x1f2   :  { %1263 = vmatprep.subr.bf16.mxu0 %v2818_v18 }
 0x1f5   :  { %1264 = vmatpush1.bf16.msra.mxu0 %v2816_v19 }
 0x1f6   :  { %1265 = vmatprep.subr.bf16.mxu0 %v2821_v30 }
 0x1f9   :  { %1266 = vmatpush1.bf16.msra.mxu0 %v2819_v31 }
 0x1fa   :  { %2676 = vmatprep.subr.bf16.mxu0 %v3203_v17 }
 0x2af   :  { %v1020_v21 = vpop.f32.mrb[8].mxu0 }
 0x2b0   :  { %v1021_v22 = vadd.f32 %v2376_v20, %v1020_v21  ;;  %v2634_v23 = vpop.f32.mrb[9].mxu0 }
 0x2b1   :  { %v1023_v24 = vpop.f32.mrb[10].mxu0 }
 0x2b2   :  { %v1024_v25 = vadd.f32 %v2376_v20, %v1023_v24  ;;  %v2635_v26 = vpop.f32.mrb[11].mxu0  ;;  %v1027_v27 = vmax.f32 %v1021_v22, 0.0 }
 0x2b3   :  { %v1316_v26 = vld [vmem:[#allocation5] sm:$0xff] }
 0x2b4   :  { %v1028_v28 = vmax.f32 %v1024_v25, 0.0 }
 0x2b6   :  { %v1029_v29 = vpack.c.bf16 %v1028_v28, %v1027_v27 }
 0x2b8   :  { %2653 = vmatmul.mubr.bf16.vlgmr.msra.gmra.mrb[8].mxu1 %v1029_v29  ;;  %v1317_v29 = vld [vmem:[#allocation5 + $0x8] sm:$0xff] }
 0x2b9   :  { %2672 = vmatprep.mubr.msk.bf16.mxu1 %vm3204_vm0, %v3203_v17  ;;  %2657 = vmatpush3.bf16.msra.mxu1 %v2822_v41  ;;  %v1554_v41 = vld [vmem:[#allocation16 + $0x8] sm:$0xff] }
 0x2ba   :  { %2658 = vmatprep.subr.bf16.mxu1 %v3203_v17 }
 0x2bd   :  { %2659 = vmatpush3.bf16.msra.mxu1 %v2823_v42 }
 0x2be   :  { %2660 = vmatprep.subr.bf16.mxu1 %v3203_v17 }
 0x2c1   :  { %2661 = vmatpush3.bf16.msra.mxu1 %v2824_v43 }
 0x2c2   :  { %2662 = vmatprep.subr.bf16.mxu1 %v3203_v17 }
 0x2c5   :  { %2663 = vmatpush3.bf16.msra.mxu1 %v2825_v44  ;;  %v1558_v44 = vld [vmem:[#allocation16 + $0x28] sm:$0xff] }
 0x2c6   :  { %2664 = vmatprep.subr.bf16.mxu1 %v3203_v17 }
 0x2c9   :  { %2665 = vmatpush3.bf16.msra.mxu1 %v2826_v45  ;;  %v1561_v45 = vld [vmem:[#allocation16 + $0x40] sm:$0xff] }
 0x2ca   :  { %2666 = vmatprep.subr.bf16.mxu1 %v3203_v17 }
 0x2cd   :  { %2667 = vmatpush3.bf16.msra.mxu1 %v2827_v46  ;;  %v1565_v46 = vld [vmem:[#allocation16 + $0x60] sm:$0xff] }
 0x2ce   :  { %2668 = vmatprep.subr.bf16.mxu1 %v3203_v17 }
 0x2d1   :  { %2669 = vmatpush3.bf16.msra.mxu1 %v2828_v47  ;;  %v2430_v47 = vcombine.low %v1554_v41, %v1558_v44 }
 0x2d2   :  { %2670 = vmatprep.subr.bf16.mxu1 %v3203_v17 }
 0x2d5   :  { %2671 = vmatpush3.bf16.msra.mxu1 %v2829_v48  ;;  %v2431_v48 = vcombine.high %v1554_v41, %v1558_v44  ;;  %v1606_v41 = vld [vmem:[#allocation16 + $0x1a8] sm:$0xff] }
 0x38b   :  { %v1135_v34 = vpop.f32.mrb[8].mxu1 }
 0x38c   :  { %v2654_v35 = vpop.f32.mrb[9].mxu1  ;;  %v1136_v37 = vadd.f32 %v2385_v33, %v1135_v34 }
 0x38d   :  { %v1138_v36 = vpop.f32.mrb[10].mxu1 }
 0x38e   :  { %v1139_v38 = vadd.f32 %v2385_v33, %v1138_v36  ;;  %v2655_v39 = vpop.f32.mrb[11].mxu1 }
 0x38f   :  { %v1553_v39 = vld [vmem:[#allocation16] sm:$0xff] }
 0x390   :  { %v1142_v40 = vpack.c.bf16 %v1139_v38, %v1136_v37  ;;  %v2836_v37 = vld [vmem:[#allocation14 + $0x30] sm:$0xff]   ;;  %v2837_v38 = vld [vmem:[#allocation14 + $0x38] sm:$0xff]  }
 0x392   :  { %1284 = vmatmul.mubr.bf16.vlgmr.msra.gmra.mrb[12].mxu0 %v1142_v40  ;;  %v1557_v40 = vld [vmem:[#allocation16 + $0x20] sm:$0xff] }
 0x393   :  { %2692 = vmatprep.mubr.msk.bf16.mxu0 %vm3204_vm0, %v3203_v17  ;;  %2677 = vmatpush3.bf16.msra.mxu0 %v2830_v49  ;;  %v2428_v42 = vcombine.low %v1553_v39, %v1557_v40  ;;  %v2429_v43 = vcombine.high %v1553_v39, %v1557_v40  ;;  %v2437_v49 = vcombine.high %v1561_v45, %v1565_v46  ;;  %v1602_v39 = vld [vmem:[#allocation16 + $0x188] sm:$0xff] }
 0x394   :  { %2678 = vmatprep.subr.bf16.mxu0 %v3203_v17  ;;  %v2479_v44 = vcombine.high %v1602_v39, %v1606_v41 }
 0x395   :  { %1979 = vmatprep.subr.bf16.mxu1 %v2429_v43  ;;  %v2478_v43 = vcombine.low %v1602_v39, %v1606_v41  ;;  %v1599_v41 = vld [vmem:[#allocation16 + $0x170] sm:$0xff] }
 0x397   :  { %2679 = vmatpush3.bf16.msra.mxu0 %v2831_v50  ;;  %v2436_v50 = vcombine.low %v1561_v45, %v1565_v46  ;;  %v1609_v45 = vld [vmem:[#allocation16 + $0x1c0] sm:$0xff] }
 0x398   :  { %2680 = vmatprep.subr.bf16.mxu0 %v3203_v17  ;;  %v1613_v46 = vld [vmem:[#allocation16 + $0x1e0] sm:$0xff] }
 0x39b   :  { %2681 = vmatpush3.bf16.msra.mxu0 %v2832_v51  ;;  %v1569_v51 = vld [vmem:[#allocation16 + $0x80] sm:$0xff] }
 0x39c   :  { %2682 = vmatprep.subr.bf16.mxu0 %v3203_v17 }
 0x39f   :  { %2683 = vmatpush3.bf16.msra.mxu0 %v2833_v52 }
 0x3a0   :  { %2684 = vmatprep.subr.bf16.mxu0 %v3203_v17 }
 0x3a3   :  { %2685 = vmatpush3.bf16.msra.mxu0 %v2834_v53 }
 0x3a4   :  { %2686 = vmatprep.subr.bf16.mxu0 %v3203_v17 }
 0x3a7   :  { %2687 = vmatpush3.bf16.msra.mxu0 %v2835_v54  ;;  %v1577_v54 = vld [vmem:[#allocation16 + $0xc0] sm:$0xff] }
 0x3a8   :  { %2688 = vmatprep.subr.bf16.mxu0 %v3203_v17  ;;  %v2453_v58 = vcombine.high %v1577_v54, %v1581_v55 }
 0x3ab   :  { %2689 = vmatpush3.bf16.msra.mxu0 %v2836_v37  ;;  %v1601_v37 = vld [vmem:[#allocation16 + $0x180] sm:$0xff] }
 0x3ac   :  { %2690 = vmatprep.subr.bf16.mxu0 %v3203_v17  ;;  %v1573_v17 = vld [vmem:[#allocation16 + $0xa0] sm:$0xff] }
 0x3ad   :  { %v2445_v52 = vcombine.high %v1569_v51, %v1573_v17  ;;  %v2444_v53 = vcombine.low %v1569_v51, %v1573_v17 }
 0x3af   :  { %2691 = vmatpush3.bf16.msra.mxu0 %v2837_v38  ;;  %v1605_v38 = vld [vmem:[#allocation16 + $0x1a0] sm:$0xff] }
 0x3b0   :  { %2022 = vmatprep.subr.bf16.mxu0 %v2431_v48  ;;  %v2477_v40 = vcombine.high %v1601_v37, %v1605_v38  ;;  %v2485_v48 = vcombine.high %v1609_v45, %v1613_v46 }
 0x465   :  { %v1285_v62 = vpop.f32.mrb[12].mxu0 }
 0x466   :  { %v1286_v63 = vadd.f32 %v1285_v62, %v1164_v60  ;;  %v1287_v0 = vpop.f32.mrb[13].mxu0  ;;  %v1589_v62 = vld [vmem:[#allocation16 + $0x120] sm:$0xff] }
 0x467   :  { %v1288_v1 = vadd.f32 %v1287_v0, %v1168_v61  ;;  %v1289_v2 = vpop.f32.mrb[14].mxu0 }
 0x468   :  { %2247 = vst [vmem:[#allocation18] sm:$0xff] %v1286_v63  ;;  %v1290_v3 = vadd.f32 %v1289_v2, %v1164_v60  ;;  %v1291_v4 = vpop.f32.mrb[15].mxu0  ;;  %v2452_v60 = vcombine.low %v1577_v54, %v1581_v55  ;;  %v1597_v2 = vld [vmem:[#allocation16 + $0x160] sm:$0xff]  ;;  %v1556_v54 = vld [vmem:[#allocation16 + $0x18] sm:$0xff] }
 0x469   :  { %v1296_v5 = vand.u32 2147483647, %v1288_v1  ;;  %v1292_v6 = vadd.f32 %v1291_v4, %v1168_v61  ;;  %v1294_v18 = vmax.f32 %v1288_v1, 0.0  ;;  %v1585_v61 = vld [vmem:[#allocation16 + $0x100] sm:$0xff] }
 0x46a   :  { %2248 = vst [vmem:[#allocation18 + $0x8] sm:$0xff] %v1290_v3  ;;  %v2460_v0 = vcombine.low %v1585_v61, %v1589_v62  ;;  %v1593_v1 = vld [vmem:[#allocation16 + $0x140] sm:$0xff] }
 0x46b   :  { %v1298_v7 = vsub.f32 0.0, %v1296_v5  ;;  %v1297_v8 = vand.u32 2147483647, %v1292_v6  ;;  %v1295_v22 = vmax.f32 %v1292_v6, 0.0  ;;  %v2468_v4 = vcombine.low %v1593_v1, %v1597_v2  ;;  %v2410_v5 = vld [vmem:[%s3594_s11] ss:$0 sm:$0xff] }
 0x46d   :  { %v1300_v9 = vmul.f32 1.442695, %v1298_v7  ;;  %v1299_v10 = vsub.f32 0.0, %v1297_v8 }
 0x46f   :  { %2838 = vpow2.f32 %v1300_v9  ;;  %v1302_v11 = vmul.f32 1.442695, %v1299_v10 }
 0x471   :  { %2840 = vpow2.f32 %v1302_v11 }
 0x479   :  { %v2839_v12 = vpop.eup %2838 }
 0x47a   :  { %v1304_v13 = vadd.f32 1.0, %v2839_v12  ;;  %v1562_v12 = vld [vmem:[#allocation16 + $0x48] sm:$0xff] }
 0x47b   :  { %v2841_v14 = vpop.eup %2840 }
 0x47c   :  { %2842 = vlog2.f32 %v1304_v13  ;;  %v1305_v15 = vadd.f32 1.0, %v2841_v14  ;;  %v1566_v13 = vld [vmem:[#allocation16 + $0x68] sm:$0xff] }
 0x47e   :  { %2844 = vlog2.f32 %v1305_v15 }
 0x486   :  { %v2843_v16 = vpop.eup %2842 }
 0x487   :  { %v1307_v19 = vmul.f32 0.6931472, %v2843_v16 }
 0x488   :  { %v2845_v20 = vpop.eup %2844 }
 0x489   :  { %v1310_v21 = vadd.f32 %v1307_v19, %v1294_v18  ;;  %v1309_v23 = vmul.f32 0.6931472, %v2845_v20  ;;  %v2439_v18 = vcombine.high %v1562_v12, %v1566_v13  ;;  %v1570_v19 = vld [vmem:[#allocation16 + $0x88] sm:$0xff] }
 0x48a   :  { %v1574_v20 = vld [vmem:[#allocation16 + $0xa8] sm:$0xff] }
 0x48b   :  { %v1312_v24 = vmax.f32 %v1310_v21, 0.0001  ;;  %v1311_v25 = vadd.f32 %v1309_v23, %v1295_v22  ;;  %v2438_v21 = vcombine.low %v1562_v12, %v1566_v13  ;;  %v2447_v22 = vcombine.high %v1570_v19, %v1574_v20  ;;  %v1578_v23 = vld [vmem:[#allocation16 + $0xc8] sm:$0xff] }
 0x48d   :  { %v1314_v27 = vmin.f32 %v1312_v24, 5.0  ;;  %v1313_v28 = vmax.f32 %v1311_v25, 0.0001  ;;  %v1582_v24 = vld [vmem:[#allocation16 + $0xe8] sm:$0xff]  ;;  %v2446_v25 = vcombine.low %v1570_v19, %v1574_v20  ;;  %v1576_v19 = vld [vmem:[#allocation16 + $0xb8] sm:$0xff] }
 0x48f   :  { %v1318_v30 = vmul.f32 %v1316_v26, %v1314_v27  ;;  %2249 = vst [vmem:[#allocation20] sm:$0xff] %v1314_v27  ;;  %v1315_v31 = vmin.f32 %v1313_v28, 5.0  ;;  %v2455_v26 = vcombine.high %v1578_v23, %v1582_v24  ;;  %v1586_v27 = vld [vmem:[#allocation16 + $0x108] sm:$0xff] }
 0x490   :  { %v1590_v28 = vld [vmem:[#allocation16 + $0x128] sm:$0xff] }
 0x491   :  { %v1319_v33 = vmul.f32 %v1317_v29, %v1315_v31  ;;  %2250 = vst [vmem:[#allocation20 + $0x8] sm:$0xff] %v1315_v31  ;;  %v1320_v34 = vadd.f32 %v1318_v30, %v1286_v63  ;;  %v2461_v63 = vcombine.high %v1585_v61, %v1589_v62  ;;  %v2454_v29 = vcombine.low %v1578_v23, %v1582_v24  ;;  %v1594_v31 = vld [vmem:[#allocation16 + $0x148] sm:$0xff]  ;;  %v1579_v24 = vld [vmem:[#allocation16 + $0xd0] sm:$0xff] }
 0x492   :  { %v2463_v30 = vcombine.high %v1586_v27, %v1590_v28 }
 0x493   :  { %v1321_v35 = vadd.f32 %v1319_v33, %v1290_v3  ;;  %v2469_v3 = vcombine.high %v1593_v1, %v1597_v2  ;;  %v1598_v33 = vld [vmem:[#allocation16 + $0x168] sm:$0xff] }
 0x495   :  { %v1322_v36 = vpack.c.bf16 %v1321_v35, %v1320_v34  ;;  %v2462_v34 = vcombine.low %v1586_v27, %v1590_v28  ;;  %v2471_v35 = vcombine.high %v1594_v31, %v1598_v33  ;;  %v1584_v27 = vld [vmem:[#allocation16 + $0xf8] sm:$0xff] }
 0x497   :  { %2673 = vmatmul.mubr.bf16.vlgmr.msra.gmra.mrb[12].mxu1 %v1322_v36  ;;  %v2470_v36 = vcombine.low %v1594_v31, %v1598_v33  ;;  %v1587_v33 = vld [vmem:[#allocation16 + $0x110] sm:$0xff] }
 0x498   :  { %2011 = vmatprep.mubr.bf16.mxu1 %v3205_v32  ;;  %1980 = vmatpush1.bf16.msra.mxu1 %v2428_v42  ;;  %v2476_v42 = vcombine.low %v1601_v37, %v1605_v38 }
 0x499   :  { %1981 = vmatprep.subr.bf16.mxu1 %v2437_v49  ;;  %v1614_v49 = vld [vmem:[#allocation16 + $0x1e8] sm:$0xff] }
 0x49c   :  { %1982 = vmatpush1.bf16.msra.mxu1 %v2436_v50  ;;  %v2484_v50 = vcombine.low %v1609_v45, %v1613_v46 }
 0x49d   :  { %1983 = vmatprep.subr.bf16.mxu1 %v2445_v52  ;;  %v1555_v52 = vld [vmem:[#allocation16 + $0x10] sm:$0xff] }
 0x4a0   :  { %1984 = vmatpush1.bf16.msra.mxu1 %v2444_v53  ;;  %v1559_v53 = vld [vmem:[#allocation16 + $0x30] sm:$0xff] }
 0x4a1   :  { %1985 = vmatprep.subr.bf16.mxu1 %v2453_v58  ;;  %v2432_v55 = vcombine.low %v1555_v52, %v1559_v53  ;;  %v2433_v58 = vcombine.high %v1555_v52, %v1559_v53 }
 0x4a4   :  { %1986 = vmatpush1.bf16.msra.mxu1 %v2452_v60  ;;  %v1560_v60 = vld [vmem:[#allocation16 + $0x38] sm:$0xff] }
 0x4a5   :  { %1987 = vmatprep.subr.bf16.mxu1 %v2461_v63  ;;  %v2434_v61 = vcombine.low %v1556_v54, %v1560_v60  ;;  %v2435_v62 = vcombine.high %v1556_v54, %v1560_v60  ;;  %v2419_v63 = vld [vmem:[%s3596_s13] ss:$0 sm:$0xff]  ;;  %v1612_v60 = vld [vmem:[#allocation16 + $0x1d8] sm:$0xff]  ;;  %s3206_s13 = smov [#allocation18]  }
 0x4a6   :  { %s2268_s29 = sshll.u32 %s3206_s13, 4  ;;  %s2269_s29 = int_to_ptr.vmem [resolvable:$true] %s2268_s29 }
 0x4a7   :  { %s3108_s16 = scalar_lea.vmem %s2269_s29, 256  ;;  %p3113_p3 = scmp.lt.s32.totalorder %s2269_s29, %s2269_s29 }
 0x4a8   :  { %1988 = vmatpush1.bf16.msra.mxu1 %v2460_v0  ;;  %p3109_p2 = scmp.ne.s32.totalorder %s2269_s29, %s3108_s16  ;;  %p3114_p4 = scmp.lt.s32.totalorder %s3108_s16, %s3108_s16 }
 0x4a9   :  { %1989 = vmatprep.subr.bf16.mxu1 %v2469_v3 }
 0x4aa   :  { %p3115_p5 = por %p3114_p4, %p3113_p3 }
 0x4ac   :  { %1990 = vmatpush1.bf16.msra.mxu1 %v2468_v4  ;;  %p3116_p6 = pnand %p3115_p5, %p3109_p2 }
 0x4ad   :  { %1991 = vmatprep.subr.bf16.mxu1 %v2477_v40  ;;  %v1595_v40 = vld [vmem:[#allocation16 + $0x150] sm:$0xff] }
 0x4ae   :  { %v2473_v46 = vcombine.high %v1595_v40, %v1599_v41 }
 0x4b0   :  { %1992 = vmatpush1.bf16.msra.mxu1 %v2476_v42  ;;  %v1596_v42 = vld [vmem:[#allocation16 + $0x158] sm:$0xff] }
 0x4b1   :  { %1993 = vmatprep.subr.bf16.mxu1 %v2485_v48  ;;  %v1603_v48 = vld [vmem:[#allocation16 + $0x190] sm:$0xff] }
 0x4b4   :  { %1994 = vmatpush1.bf16.msra.mxu1 %v2484_v50  ;;  %v1604_v50 = vld [vmem:[#allocation16 + $0x198] sm:$0xff] }
 0x4b5   :  { %2065 = vmatprep.subr.bf16.mxu1 %v2433_v58  ;;  %v1615_v58 = vld [vmem:[#allocation16 + $0x1f0] sm:$0xff] }
 0x56a   :  { %v1428_v6 = vpop.f32.mrb[12].mxu1 }
 0x56b   :  { %v1429_v7 = vadd.f32 %v2410_v5, %v1428_v6  ;;  %v2674_v8 = vpop.f32.mrb[13].mxu1  ;;  %v1563_v6 = vld [vmem:[#allocation16 + $0x50] sm:$0xff] }
 0x56c   :  { %v1431_v9 = vpop.f32.mrb[14].mxu1  ;;  %v1564_v8 = vld [vmem:[#allocation16 + $0x58] sm:$0xff] }
 0x56d   :  { %v1432_v10 = vadd.f32 %v2410_v5, %v1431_v9  ;;  %v2675_v11 = vpop.f32.mrb[15].mxu1  ;;  %v1435_v14 = vmax.f32 %v1429_v7, 0.0  ;;  %v1567_v7 = vld [vmem:[#allocation16 + $0x70] sm:$0xff]  ;;  %v1568_v9 = vld [vmem:[#allocation16 + $0x78] sm:$0xff] }
 0x56e   :  { %v2441_v13 = vcombine.high %v1563_v6, %v1567_v7  ;;  %v2440_v20 = vcombine.low %v1563_v6, %v1567_v7 }
 0x56f   :  { %v1436_v15 = vmax.f32 %v1432_v10, 0.0 }
 0x571   :  { %v1437_v16 = vpack.c.bf16 %v1436_v15, %v1435_v14  ;;  %v2443_v14 = vcombine.high %v1564_v8, %v1568_v9  ;;  %v1571_v15 = vld [vmem:[#allocation16 + $0x90] sm:$0xff] }
 0x573   :  { %2693 = vmatmul.mubr.bf16.vlgmr.msra.gmra.mrb[16].mxu0 %v1437_v16  ;;  %v1575_v16 = vld [vmem:[#allocation16 + $0xb0] sm:$0xff] }
 0x574   :  { %2023 = vmatpush1.bf16.msra.mxu0 %v2430_v47  ;;  %2054 = vmatprep.mubr.bf16.mxu0 %v3205_v32  ;;  %v1610_v47 = vld [vmem:[#allocation16 + $0x1c8] sm:$0xff]  ;;  %v2448_v28 = vcombine.low %v1571_v15, %v1575_v16 }
 0x575   :  { %2024 = vmatprep.subr.bf16.mxu0 %v2439_v18  ;;  %v2486_v51 = vcombine.low %v1610_v47, %v1614_v49  ;;  %v2487_v17 = vcombine.high %v1610_v47, %v1614_v49  ;;  %v1572_v18 = vld [vmem:[#allocation16 + $0x98] sm:$0xff]  ;;  %v1607_v49 = vld [vmem:[#allocation16 + $0x1b0] sm:$0xff] }
 0x576   :  { %v2451_v23 = vcombine.high %v1572_v18, %v1576_v19  ;;  %v2481_v53 = vcombine.high %v1603_v48, %v1607_v49 }
 0x578   :  { %2025 = vmatpush1.bf16.msra.mxu0 %v2438_v21  ;;  %v2442_v21 = vcombine.low %v1564_v8, %v1568_v9 }
 0x579   :  { %2026 = vmatprep.subr.bf16.mxu0 %v2447_v22  ;;  %v2449_v22 = vcombine.high %v1571_v15, %v1575_v16 }
 0x57c   :  { %2027 = vmatpush1.bf16.msra.mxu0 %v2446_v25  ;;  %v1583_v25 = vld [vmem:[#allocation16 + $0xf0] sm:$0xff] }
 0x57d   :  { %2028 = vmatprep.subr.bf16.mxu0 %v2455_v26  ;;  %v1580_v26 = vld [vmem:[#allocation16 + $0xd8] sm:$0xff]  ;;  %v2456_v37 = vcombine.low %v1579_v24, %v1583_v25 }
 0x57e   :  { %v2459_v31 = vcombine.high %v1580_v26, %v1584_v27  ;;  %v2458_v38 = vcombine.low %v1580_v26, %v1584_v27 }
 0x580   :  { %2029 = vmatpush1.bf16.msra.mxu0 %v2454_v29  ;;  %v2450_v29 = vcombine.low %v1572_v18, %v1576_v19 }
 0x581   :  { %2030 = vmatprep.subr.bf16.mxu0 %v2463_v30  ;;  %v2457_v30 = vcombine.high %v1579_v24, %v1583_v25 }
 0x584   :  { %2031 = vmatpush1.bf16.msra.mxu0 %v2462_v34  ;;  %v1591_v34 = vld [vmem:[#allocation16 + $0x130] sm:$0xff] }
 0x585   :  { %2032 = vmatprep.subr.bf16.mxu0 %v2471_v35  ;;  %v1588_v35 = vld [vmem:[#allocation16 + $0x118] sm:$0xff]  ;;  %v2465_v39 = vcombine.high %v1587_v33, %v1591_v34 }
 0x588   :  { %2033 = vmatpush1.bf16.msra.mxu0 %v2470_v36  ;;  %v1592_v36 = vld [vmem:[#allocation16 + $0x138] sm:$0xff] }
 0x589   :  { %2034 = vmatprep.subr.bf16.mxu0 %v2479_v44  ;;  %v2464_v44 = vcombine.low %v1587_v33, %v1591_v34  ;;  %v2466_v45 = vcombine.low %v1588_v35, %v1592_v36 }
 0x58c   :  { %2035 = vmatpush1.bf16.msra.mxu0 %v2478_v43  ;;  %v1600_v43 = vld [vmem:[#allocation16 + $0x178] sm:$0xff] }
 0x58d   :  { %2036 = vmatprep.subr.bf16.mxu0 %v2487_v17  ;;  %v2475_v47 = vcombine.high %v1596_v42, %v1600_v43  ;;  %v2472_v17 = vcombine.low %v1595_v40, %v1599_v41  ;;  %v2474_v52 = vcombine.low %v1596_v42, %v1600_v43 }
 0x590   :  { %2037 = vmatpush1.bf16.msra.mxu0 %v2486_v51  ;;  %v1608_v51 = vld [vmem:[#allocation16 + $0x1b8] sm:$0xff] }
 0x591   :  { %2108 = vmatprep.subr.bf16.mxu0 %v2435_v62  ;;  %v2483_v54 = vcombine.high %v1604_v50, %v1608_v51  ;;  %v2480_v62 = vcombine.low %v1603_v48, %v1607_v49 }
 0x646   :  { %v1543_v0 = vpop.f32.mrb[16].mxu0 }
 0x647   :  { %v1544_v1 = vadd.f32 %v2419_v63, %v1543_v0  ;;  %v2694_v2 = vpop.f32.mrb[17].mxu0 }
 0x648   :  { %v1546_v3 = vpop.f32.mrb[18].mxu0 }
 0x649   :  { %v1547_v4 = vadd.f32 %v2419_v63, %v1546_v3  ;;  %v2695_v5 = vpop.f32.mrb[19].mxu0  ;;  %v1550_v10 = vmax.f32 %v1544_v1, 0.0  ;;  %v2482_v63 = vcombine.low %v1604_v50, %v1608_v51 }
 0x64b   :  { %v1551_v11 = vmax.f32 %v1547_v4, 0.0 }
 0x64d   :  { %v3509_v12 = vpack.c.bf16 %v1551_v11, %v1550_v10 }
 0x64f   :  { %2012 = vmatmul.mubr.bf16.vlgmr.msra.gmra.mrb[16].mxu1 %v3509_v12  ;;  %2055 = vmatmul.mubr.bf16.vlgmr.msra.gmra.mrb[20].mxu0 %v3509_v12 }
 0x650   :  { %2066 = vmatpush1.bf16.msra.mxu1 %v2432_v55  ;;  %2109 = vmatpush1.bf16.msra.mxu0 %v2434_v61  ;;  %v1611_v55 = vld [vmem:[#allocation16 + $0x1d0] sm:$0xff]  ;;  %v1616_v61 = vld [vmem:[#allocation16 + $0x1f8] sm:$0xff] }
 0x651   :  { %2067 = vmatprep.subr.bf16.mxu1 %v2441_v13  ;;  %2110 = vmatprep.subr.bf16.mxu0 %v2443_v14  ;;  %v2489_v0 = vcombine.high %v1611_v55, %v1615_v58  ;;  %v2491_v1 = vcombine.high %v1612_v60, %v1616_v61  ;;  %v2488_v2 = vcombine.low %v1611_v55, %v1615_v58 }
 0x652   :  { %2097 = vmatprep.mubr.bf16.mxu1 %v3205_v32  ;;  %2140 = vmatprep.mubr.bf16.mxu0 %v3205_v32  ;;  %v2467_v32 = vcombine.high %v1588_v35, %v1592_v36  ;;  %v2490_v3 = vcombine.low %v1612_v60, %v1616_v61 }
 0x654   :  { %2068 = vmatpush1.bf16.msra.mxu1 %v2440_v20  ;;  %2111 = vmatpush1.bf16.msra.mxu0 %v2442_v21 }
 0x655   :  { %2069 = vmatprep.subr.bf16.mxu1 %v2449_v22  ;;  %2112 = vmatprep.subr.bf16.mxu0 %v2451_v23 }
 0x658   :  { %2070 = vmatpush1.bf16.msra.mxu1 %v2448_v28  ;;  %2113 = vmatpush1.bf16.msra.mxu0 %v2450_v29 }
 0x659   :  { %2071 = vmatprep.subr.bf16.mxu1 %v2457_v30  ;;  %2114 = vmatprep.subr.bf16.mxu0 %v2459_v31 }
 0x65c   :  { %2072 = vmatpush1.bf16.msra.mxu1 %v2456_v37  ;;  %2115 = vmatpush1.bf16.msra.mxu0 %v2458_v38 }
 0x65d   :  { %2073 = vmatprep.subr.bf16.mxu1 %v2465_v39  ;;  %2116 = vmatprep.subr.bf16.mxu0 %v2467_v32 }
 0x660   :  { %2074 = vmatpush1.bf16.msra.mxu1 %v2464_v44  ;;  %2117 = vmatpush1.bf16.msra.mxu0 %v2466_v45 }
 0x661   :  { %2075 = vmatprep.subr.bf16.mxu1 %v2473_v46  ;;  %2118 = vmatprep.subr.bf16.mxu0 %v2475_v47 }
 0x664   :  { %2076 = vmatpush1.bf16.msra.mxu1 %v2472_v17  ;;  %2119 = vmatpush1.bf16.msra.mxu0 %v2474_v52 }
 0x665   :  { %2077 = vmatprep.subr.bf16.mxu1 %v2481_v53  ;;  %2120 = vmatprep.subr.bf16.mxu0 %v2483_v54 }
 0x668   :  { %2078 = vmatpush1.bf16.msra.mxu1 %v2480_v62  ;;  %2121 = vmatpush1.bf16.msra.mxu0 %v2482_v63 }
 0x669   :  { %2079 = vmatprep.subr.bf16.mxu1 %v2489_v0  ;;  %2122 = vmatprep.subr.bf16.mxu0 %v2491_v1 }
 0x66c   :  { %2080 = vmatpush1.bf16.msra.mxu1 %v2488_v2  ;;  %2123 = vmatpush1.bf16.msra.mxu0 %v2490_v3 }
 0x66f   :  { %2098 = vmatmul.mubr.bf16.vlgmr.msra.gmra.mrb[20].mxu1 %v3509_v12  ;;  %2141 = vmatmul.mubr.bf16.vlgmr.msra.gmra.mrb[24].mxu0 %v3509_v12 }
 0x670   :  { %3119 = shalt.err (!%p3116_p6)
}
 0x671   :  { %s3120_s30 = scalar_lea.hbm %s3600_s17, 256 }
 0x672   :  { %p3121_p7 = scmp.ne.s32.totalorder %s3600_s17, %s3120_s30  ;;  %p3124_p8 = scmp.lt.u32.totalorder %s3120_s30, %s3600_s17 }
 0x674   :  { %p3126_p9 = pnand %p3124_p8, %p3121_p7 }
 0x676   :  { %3129 = shalt.err (!%p3126_p9)
}
 0x677   :  { %s3618_s15 = smov 8   ;;  %s3619_s2 = smov 128  }
 0x678   :  { %2274 = dma.vmem_to_hbm [thread:$0]  %s2269_s29, 256, %s3600_s17, [#allocation19], %s3619_s2, %s3619_s2, %s3618_s15  }
 0x679   :  { %s3207_s10 = smov [#allocation20]  }
 0x67a   :  { %s2280_s25 = sshll.u32 %s3207_s10, 4  ;;  %s2281_s25 = int_to_ptr.vmem [resolvable:$true] %s2280_s25 }
 0x67b   :  { %s3130_s14 = scalar_lea.vmem %s2281_s25, 256  ;;  %p3135_p11 = scmp.lt.s32.totalorder %s2281_s25, %s2281_s25 }
 0x67c   :  { %p3131_p10 = scmp.ne.s32.totalorder %s2281_s25, %s3130_s14  ;;  %p3136_p12 = scmp.lt.s32.totalorder %s3130_s14, %s3130_s14 }
 0x67e   :  { %p3137_p13 = por %p3136_p12, %p3135_p11 }
 0x680   :  { %p3138_p0 = pnand %p3137_p13, %p3131_p10 }
 0x682   :  { %3141 = shalt.err (!%p3138_p0)
}
 0x683   :  { %s3142_s26 = scalar_lea.hbm %s3601_s18, 256 }
 0x684   :  { %p3143_p1 = scmp.ne.s32.totalorder %s3601_s18, %s3142_s26  ;;  %p3146_p2 = scmp.lt.u32.totalorder %s3142_s26, %s3601_s18 }
 0x686   :  { %p3148_p3 = pnand %p3146_p2, %p3143_p1 }
 0x688   :  { %3151 = shalt.err (!%p3148_p3)
}
 0x689   :  { %2286 = dma.vmem_to_hbm [thread:$0]  %s2281_s25, 256, %s3601_s18, [#allocation19], %s3619_s2, %s3619_s2, %s3618_s15   ;;  %v1629_v4 = vsub.s32 2, %v3489_v56  ;;  %v1633_v6 = vsub.s32 3, %v3489_v56  ;;  %v1637_v60 = vsub.s32 4, %v3489_v56  ;;  %v1645_v61 = vsub.s32 6, %v3489_v56 }
 0x68a   :  { %s3620_s19 = sld [smem:[#allocation31_spill]]  ;;  %v1641_v62 = vsub.s32 5, %v3489_v56  ;;  %v1649_v63 = vsub.s32 7, %v3489_v56  ;;  %s3208_s18 = smov [#allocation17]  }
 0x68b   :  { %s2256_s13 = sshll.u32 %s3208_s18, 4  ;;  %s2257_s13 = int_to_ptr.vmem [resolvable:$true] %s2256_s13 }
 0x68c   :  { %s3152_s29 = scalar_lea.vmem %s2257_s13, 2048  ;;  %p3157_p5 = scmp.lt.s32.totalorder %s2257_s13, %s2257_s13 }
 0x68d   :  { %p3153_p4 = scmp.ne.s32.totalorder %s2257_s13, %s3152_s29  ;;  %p3158_p6 = scmp.lt.s32.totalorder %s3152_s29, %s3152_s29 }
 0x68f   :  { %p3159_p7 = por %p3158_p6, %p3157_p5 }
 0x690   :  { %v3551_v5 = vld [vmem:[%s3620_s19] sm:$0xff] }
 0x691   :  { %v1622_v7 = vrot.slane %v3551_v5, %v1163_v57  ;;  %v1630_v8 = vrot.slane %v3551_v5, %v1629_v4  ;;  %v1626_v9 = vrot.slane %v3551_v5, %v1167_v59  ;;  %v1634_v10 = vrot.slane %v3551_v5, %v1633_v6  ;;  %p3160_p8 = pnand %p3159_p7, %p3153_p4 }
 0x692   :  { %v1638_v0 = vrot.slane %v3551_v5, %v1637_v60  ;;  %v1646_v1 = vrot.slane %v3551_v5, %v1645_v61  ;;  %v1642_v3 = vrot.slane %v3551_v5, %v1641_v62  ;;  %v1650_v4 = vrot.slane %v3551_v5, %v1649_v63 }
 0x722   :  { %v2013_v11 = vpop.f32.mrb[16].mxu1  ;;  %v2056_v12 = vpop.f32.mrb[20].mxu0 }
 0x723   :  { %v2014_v13 = vadd.f32 %v2013_v11, %v1622_v7  ;;  %v2057_v14 = vadd.f32 %v2056_v12, %v1630_v8  ;;  %v2015_v15 = vpop.f32.mrb[17].mxu1  ;;  %v2058_v16 = vpop.f32.mrb[21].mxu0 }
 0x724   :  { %v2016_v18 = vadd.f32 %v2015_v15, %v1626_v9  ;;  %v2059_v19 = vadd.f32 %v2058_v16, %v1634_v10  ;;  %v2017_v20 = vpop.f32.mrb[18].mxu1  ;;  %v2060_v21 = vpop.f32.mrb[22].mxu0 }
 0x725   :  { %v2151_v22 = vsub.f32 0.0, %v2014_v13  ;;  %v2153_v57 = vsub.f32 0.0, %v2057_v14  ;;  %v2018_v23 = vadd.f32 %v2017_v20, %v1622_v7  ;;  %v2061_v24 = vadd.f32 %v2060_v21, %v1630_v8  ;;  %v2019_v25 = vpop.f32.mrb[19].mxu1  ;;  %v2062_v26 = vpop.f32.mrb[23].mxu0 }
 0x726   :  { %v2152_v27 = vsub.f32 0.0, %v2016_v18  ;;  %v2154_v59 = vsub.f32 0.0, %v2059_v19  ;;  %v2020_v28 = vadd.f32 %v2019_v25, %v1626_v9  ;;  %v2063_v29 = vadd.f32 %v2062_v26, %v1634_v10 }
 0x727   :  { %v2167_v30 = vmul.f32 1.442695, %v2151_v22  ;;  %v2171_v31 = vmul.f32 1.442695, %v2153_v57  ;;  %v2159_v33 = vsub.f32 0.0, %v2018_v23  ;;  %v2161_v34 = vsub.f32 0.0, %v2061_v24 }
 0x728   :  { %v2169_v35 = vmul.f32 1.442695, %v2152_v27  ;;  %v2173_v36 = vmul.f32 1.442695, %v2154_v59  ;;  %v2160_v37 = vsub.f32 0.0, %v2020_v28  ;;  %v2162_v38 = vsub.f32 0.0, %v2063_v29 }
 0x729   :  { %2846 = vpow2.f32 %v2167_v30  ;;  %v2183_v39 = vmul.f32 1.442695, %v2159_v33  ;;  %v2187_v32 = vmul.f32 1.442695, %v2161_v34 }
 0x72a   :  { %2848 = vpow2.f32 %v2171_v31  ;;  %v2185_v40 = vmul.f32 1.442695, %v2160_v37  ;;  %v2189_v41 = vmul.f32 1.442695, %v2162_v38 }
 0x72b   :  { %2850 = vpow2.f32 %v2169_v35 }
 0x72c   :  { %2852 = vpow2.f32 %v2173_v36 }
 0x72d   :  { %2854 = vpow2.f32 %v2183_v39 }
 0x72e   :  { %2856 = vpow2.f32 %v2187_v32 }
 0x72f   :  { %2858 = vpow2.f32 %v2185_v40 }
 0x730   :  { %2860 = vpow2.f32 %v2189_v41 }
 0x733   :  { %v2847_v42 = vpop.eup %2846 }
 0x734   :  { %v2849_v43 = vpop.eup %2848  ;;  %v2199_v44 = vadd.f32 1.0, %v2847_v42 }
 0x735   :  { %v2851_v45 = vpop.eup %2850  ;;  %v2201_v46 = vadd.f32 1.0, %v2849_v43 }
 0x736   :  { %v2853_v47 = vpop.eup %2852  ;;  %2862 = vrcp.f32 %v2199_v44  ;;  %v2200_v48 = vadd.f32 1.0, %v2851_v45 }
 0x737   :  { %v2855_v49 = vpop.eup %2854  ;;  %2864 = vrcp.f32 %v2201_v46  ;;  %v2202_v50 = vadd.f32 1.0, %v2853_v47 }
 0x738   :  { %v2857_v51 = vpop.eup %2856  ;;  %2866 = vrcp.f32 %v2200_v48  ;;  %v2207_v17 = vadd.f32 1.0, %v2855_v49 }
 0x739   :  { %v2859_v52 = vpop.eup %2858  ;;  %2868 = vrcp.f32 %v2202_v50  ;;  %v2209_v53 = vadd.f32 1.0, %v2857_v51 }
 0x73a   :  { %v2861_v54 = vpop.eup %2860  ;;  %2870 = vrcp.f32 %v2207_v17  ;;  %v2208_v55 = vadd.f32 1.0, %v2859_v52 }
 0x73b   :  { %2872 = vrcp.f32 %v2209_v53  ;;  %v2210_v58 = vadd.f32 1.0, %v2861_v54 }
 0x73c   :  { %2874 = vrcp.f32 %v2208_v55 }
 0x73d   :  { %2876 = vrcp.f32 %v2210_v58 }
 0x740   :  { %v2863_v2 = vpop.eup %2862 }
 0x741   :  { %v2865_v6 = vpop.eup %2864  ;;  %2231 = vst [vmem:[#allocation17] sm:$0xff] %v2863_v2 }
 0x742   :  { %v2867_v7 = vpop.eup %2866  ;;  %2233 = vst [vmem:[#allocation17 + $0x10] sm:$0xff] %v2865_v6  ;;  %v2099_v8 = vpop.f32.mrb[20].mxu1 }
 0x743   :  { %v2142_v9 = vpop.f32.mrb[24].mxu0  ;;  %v2869_v10 = vpop.eup %2868  ;;  %2232 = vst [vmem:[#allocation17 + $0x8] sm:$0xff] %v2867_v7  ;;  %v2100_v11 = vadd.f32 %v2099_v8, %v1638_v0 }
 0x744   :  { %v2143_v56 = vadd.f32 %v2142_v9, %v1646_v1  ;;  %v2101_v12 = vpop.f32.mrb[21].mxu1  ;;  %v2144_v13 = vpop.f32.mrb[25].mxu0  ;;  %2234 = vst [vmem:[#allocation17 + $0x18] sm:$0xff] %v2869_v10 }
 0x745   :  { %v2871_v14 = vpop.eup %2870  ;;  %v2102_v15 = vadd.f32 %v2101_v12, %v1642_v3  ;;  %v2145_v16 = vadd.f32 %v2144_v13, %v1650_v4  ;;  %v2103_v18 = vpop.f32.mrb[22].mxu1  ;;  %v2155_v5 = vsub.f32 0.0, %v2100_v11 }
 0x746   :  { %v2146_v19 = vpop.f32.mrb[26].mxu0  ;;  %v2873_v20 = vpop.eup %2872  ;;  %2239 = vst [vmem:[#allocation17 + $0x40] sm:$0xff] %v2871_v14  ;;  %v2157_v21 = vsub.f32 0.0, %v2143_v56  ;;  %v2104_v22 = vadd.f32 %v2103_v18, %v1638_v0 }
 0x747   :  { %v2147_v57 = vadd.f32 %v2146_v19, %v1646_v1  ;;  %v2105_v23 = vpop.f32.mrb[23].mxu1  ;;  %v2148_v24 = vpop.f32.mrb[27].mxu0  ;;  %2241 = vst [vmem:[#allocation17 + $0x50] sm:$0xff] %v2873_v20  ;;  %v2156_v26 = vsub.f32 0.0, %v2102_v15  ;;  %v2158_v27 = vsub.f32 0.0, %v2145_v16 }
 0x748   :  { %v2875_v25 = vpop.eup %2874  ;;  %v2106_v59 = vadd.f32 %v2105_v23, %v1642_v3  ;;  %v2149_v28 = vadd.f32 %v2148_v24, %v1650_v4  ;;  %v2175_v30 = vmul.f32 1.442695, %v2155_v5  ;;  %v2179_v31 = vmul.f32 1.442695, %v2157_v21 }
 0x749   :  { %v2877_v29 = vpop.eup %2876  ;;  %2240 = vst [vmem:[#allocation17 + $0x48] sm:$0xff] %v2875_v25  ;;  %v2163_v33 = vsub.f32 0.0, %v2104_v22  ;;  %v2165_v34 = vsub.f32 0.0, %v2147_v57  ;;  %v2177_v35 = vmul.f32 1.442695, %v2156_v26 }
 0x74a   :  { %2242 = vst [vmem:[#allocation17 + $0x58] sm:$0xff] %v2877_v29  ;;  %v2181_v36 = vmul.f32 1.442695, %v2158_v27  ;;  %v2164_v37 = vsub.f32 0.0, %v2106_v59  ;;  %v2166_v38 = vsub.f32 0.0, %v2149_v28  ;;  %2878 = vpow2.f32 %v2175_v30 }
 0x74b   :  { %v2191_v39 = vmul.f32 1.442695, %v2163_v33  ;;  %2880 = vpow2.f32 %v2179_v31  ;;  %v2195_v32 = vmul.f32 1.442695, %v2165_v34 }
 0x74c   :  { %2882 = vpow2.f32 %v2177_v35  ;;  %v2193_v40 = vmul.f32 1.442695, %v2164_v37  ;;  %v2197_v41 = vmul.f32 1.442695, %v2166_v38 }
 0x74d   :  { %2884 = vpow2.f32 %v2181_v36 }
 0x74e   :  { %2886 = vpow2.f32 %v2191_v39 }
 0x74f   :  { %2888 = vpow2.f32 %v2195_v32 }
 0x750   :  { %2890 = vpow2.f32 %v2193_v40 }
 0x751   :  { %2892 = vpow2.f32 %v2197_v41 }
 0x754   :  { %v2879_v42 = vpop.eup %2878 }
 0x755   :  { %v2881_v43 = vpop.eup %2880  ;;  %v2203_v44 = vadd.f32 1.0, %v2879_v42 }
 0x756   :  { %v2883_v45 = vpop.eup %2882  ;;  %v2205_v46 = vadd.f32 1.0, %v2881_v43 }
 0x757   :  { %v2885_v47 = vpop.eup %2884  ;;  %2894 = vrcp.f32 %v2203_v44  ;;  %v2204_v48 = vadd.f32 1.0, %v2883_v45 }
 0x758   :  { %v2887_v49 = vpop.eup %2886  ;;  %2896 = vrcp.f32 %v2205_v46  ;;  %v2206_v50 = vadd.f32 1.0, %v2885_v47 }
 0x759   :  { %v2889_v51 = vpop.eup %2888  ;;  %2898 = vrcp.f32 %v2204_v48  ;;  %v2211_v17 = vadd.f32 1.0, %v2887_v49 }
 0x75a   :  { %v2891_v52 = vpop.eup %2890  ;;  %2900 = vrcp.f32 %v2206_v50  ;;  %v2213_v53 = vadd.f32 1.0, %v2889_v51 }
 0x75b   :  { %v2893_v54 = vpop.eup %2892  ;;  %2902 = vrcp.f32 %v2211_v17  ;;  %v2212_v55 = vadd.f32 1.0, %v2891_v52 }
 0x75c   :  { %2904 = vrcp.f32 %v2213_v53  ;;  %v2214_v58 = vadd.f32 1.0, %v2893_v54 }
 0x75d   :  { %2906 = vrcp.f32 %v2212_v55 }
 0x75e   :  { %2908 = vrcp.f32 %v2214_v58 }
 0x761   :  { %v2895_v60 = vpop.eup %2894 }
 0x762   :  { %v2897_v61 = vpop.eup %2896  ;;  %2235 = vst [vmem:[#allocation17 + $0x20] sm:$0xff] %v2895_v60 }
 0x763   :  { %v2899_v62 = vpop.eup %2898  ;;  %2237 = vst [vmem:[#allocation17 + $0x30] sm:$0xff] %v2897_v61 }
 0x764   :  { %v2901_v63 = vpop.eup %2900  ;;  %2236 = vst [vmem:[#allocation17 + $0x28] sm:$0xff] %v2899_v62 }
 0x765   :  { %v2903_v0 = vpop.eup %2902  ;;  %2238 = vst [vmem:[#allocation17 + $0x38] sm:$0xff] %v2901_v63 }
 0x766   :  { %v2905_v1 = vpop.eup %2904  ;;  %2243 = vst [vmem:[#allocation17 + $0x60] sm:$0xff] %v2903_v0 }
 0x767   :  { %v2907_v2 = vpop.eup %2906  ;;  %2245 = vst [vmem:[#allocation17 + $0x70] sm:$0xff] %v2905_v1 }
 0x768   :  { %v2909_v3 = vpop.eup %2908  ;;  %2244 = vst [vmem:[#allocation17 + $0x68] sm:$0xff] %v2907_v2 }
 0x769   :  { %2246 = vst [vmem:[#allocation17 + $0x78] sm:$0xff] %v2909_v3 }
 0x76a   :  { %3163 = shalt.err (!%p3160_p8)
}
 0x76b   :  { %s3621_s28 = sld [smem:[#allocation32_spill]] }
 0x771   :  { %s3164_s30 = scalar_lea.hbm %s3621_s28, 2048 }
 0x772   :  { %p3165_p9 = scmp.ne.s32.totalorder %s3621_s28, %s3164_s30  ;;  %p3168_p10 = scmp.lt.u32.totalorder %s3164_s30, %s3621_s28 }
 0x774   :  { %p3170_p11 = pnand %p3168_p10, %p3165_p9 }
 0x776   :  { %3173 = shalt.err (!%p3170_p11)
}
 0x777   :  { %s3209_s15 = smov 1024  }
 0x778   :  { %2262 = dma.vmem_to_hbm [thread:$0]  %s2257_s13, 2048, %s3621_s28, [#allocation4], %s3209_s15, %s3209_s15, %s3193_s0  }
 0x779   :  { %3184 = dma.done.wait [#allocation4], 2048  }
 0x77a   :  { %3185 = vsyncadd [#allocation4], 4294965248 }
 0x77b   :  { %3186 = dma.done.wait [#allocation19], 512  }
 0x77c   :  { %3187 = vsyncadd [#allocation19], 4294966784 }
 0x77d   :  { %2296 = vsyncpa [#allocation3], 1 }
 0x77e   :  { %2297 = vsyncpa [#allocation6], 1 }
 0x77f   :  { %2298 = vsyncpa [#allocation9], 1 }
 0x780   :  { %2299 = vsyncpa [#allocation12], 1 }
 0x781   :  { %2300 = vsyncpa [#allocation15], 1 }
 0x782   :  { %2301 = vsyncpa [#allocation4], 1 }
 0x783   :  { %2302 = vsyncpa [#allocation19], 1 }

</bundles_post_ra>
